<compile_context>
chip_gen: v7x
topology: tpu7x:2x2x1
jax: 0.10.0
libtpu: 0.0.40
codegen_flags: <defaults>
</compile_context>

<pallas_src>
import jax
import jax.numpy as jnp
from jax import lax
from jax.experimental import pallas as pl
from jax.experimental.pallas import tpu as pltpu


def _sigmoid(x):
    return 1.0 / (1.0 + jnp.exp(-x))


# ---------------------------------------------------------------------------
# Dual cross-attention kernel: grid=(2,) over {img-query, depth-query} sides,
# all N items per step, fused K|V matmul, approx-reciprocal softmax.
# ---------------------------------------------------------------------------
def _dual_cross_attention_kernel(xq_ref, xkv_ref, wq_ref, bq_ref, wkv_ref,
                                 bkv_ref, gamma_ref, out_ref):
    _, n, hw, c = xq_ref.shape
    x = xq_ref[0]                        # (N, HW, C)  query-side input
    d = xkv_ref[0]                       # (N, HW, C)  key/value-side input

    xf = x.reshape(n * hw, c)
    df = d.reshape(n * hw, c)
    q = (jnp.dot(xf, wq_ref[...], preferred_element_type=jnp.float32)
         + bq_ref[...]).reshape(n, hw, c)
    kv = (jnp.dot(df, wkv_ref[...], preferred_element_type=jnp.float32)
          + bkv_ref[...])                # (N*HW, 2C) fused K|V
    k = kv[:, :c].reshape(n, hw, c)
    v = kv[:, c:].reshape(n, hw, c)

    # att[n, i, j] = sum_p q[n, p, i] * k[n, p, j]            -> (N, C, C)
    att = lax.dot_general(q, k, (((1,), (1,)), ((0,), (0,))),
                          preferred_element_type=jnp.float32)
    att = att - jnp.max(att, axis=-1, keepdims=True)
    e = jnp.exp(att)
    probs = e * pl.reciprocal(jnp.sum(e, axis=-1, keepdims=True), approx=True)
    # out[n, p, i] = sum_j v[n, p, j] * probs[n, i, j]        -> (N, HW, C)
    out = lax.dot_general(v, probs, (((2,), (2,)), ((0,), (0,))),
                          preferred_element_type=jnp.float32)
    res = gamma_ref[0] * out + x
    out_ref[0] = res.reshape(out_ref.shape[1:])


def dual_cross_attention(feats, wq_t, bq, wkv_t, bkv, gamma, *, H, W):
    two, N, HW, C = feats.shape
    return pl.pallas_call(
        _dual_cross_attention_kernel,
        out_shape=jax.ShapeDtypeStruct((2, N, H, W, C), jnp.float32),
        grid=(2,),
        in_specs=[
            pl.BlockSpec((1, N, HW, C), lambda s: (s, 0, 0, 0)),       # query side
            pl.BlockSpec((1, N, HW, C), lambda s: (1 - s, 0, 0, 0)),   # kv side
            pl.BlockSpec((C, C), lambda s: (0, 0)),
            pl.BlockSpec((1, C), lambda s: (0, 0)),
            pl.BlockSpec((C, 2 * C), lambda s: (0, 0)),
            pl.BlockSpec((1, 2 * C), lambda s: (0, 0)),
            pl.BlockSpec(memory_space=pltpu.MemorySpace.SMEM),
        ],
        out_specs=pl.BlockSpec((1, N, H, W, C), lambda s: (s, 0, 0, 0, 0)),
        compiler_params=pltpu.CompilerParams(dimension_semantics=("parallel",)),
    )(feats, feats, wq_t, bq, wkv_t, bkv, gamma)


# ---------------------------------------------------------------------------
# 3x3 fusion conv kernel: takes img/dep attention outputs directly (no glue
# concat/pad), pads into a VMEM scratch (border-only zeroing), emits per-item
# channel sum / sum-of-squares for BatchNorm statistics.
# ---------------------------------------------------------------------------
def _fusion_conv_kernel(img_ref, dep_ref, w_ref, b_ref,
                        out_ref, sum_ref, ssq_ref, xp_ref):
    _, items, H, W, C = img_ref.shape
    Cin = 2 * C

    # Zero only the 1-pixel halo border; the interior is fully overwritten for
    # every item below.  (Done every grid step, not only on step 0: with
    # "parallel" semantics the grid may be sharded across TensorCores and each
    # core has its own scratch, so program_id==0 gating would be unsafe.)
    zrow = jnp.zeros((1, W + 2, Cin), jnp.float32)
    zcol = jnp.zeros((H, 1, Cin), jnp.float32)
    xp_ref[0:1, :, :] = zrow
    xp_ref[H + 1:H + 2, :, :] = zrow
    xp_ref[1:H + 1, 0:1, :] = zcol
    xp_ref[1:H + 1, W + 1:W + 2, :] = zcol

    bias = b_ref[...]                                        # (1, C)
    wk = [[w_ref[dh, dw] for dw in range(3)] for dh in range(3)]

    for i in range(items):
        xp_ref[1:H + 1, 1:W + 1, :] = jnp.concatenate(
            [img_ref[0, i], dep_ref[0, i]], axis=-1)         # (H, W, 2C)
        xp = xp_ref[...]                                     # (H+2, W+2, 2C)
        acc = jnp.zeros((H * W, C), jnp.float32)
        for dh in range(3):
            for dw in range(3):
                patch = xp[dh:dh + H, dw:dw + W, :].reshape(H * W, Cin)
                acc = acc + jnp.dot(patch, wk[dh][dw],
                                    preferred_element_type=jnp.float32)
        acc = acc + bias
        out_ref[i] = acc.reshape(H, W, C)
        sum_ref[i] = jnp.sum(acc, axis=0, keepdims=True)
        ssq_ref[i] = jnp.sum(acc * acc, axis=0, keepdims=True)


def fusion_conv3x3(att, w, b, *, items):
    _, N, H, W, C = att.shape
    Cin = 2 * C
    steps = N // items
    return pl.pallas_call(
        _fusion_conv_kernel,
        out_shape=(
            jax.ShapeDtypeStruct((N, H, W, C), jnp.float32),
            jax.ShapeDtypeStruct((N, 1, C), jnp.float32),   # per-item channel sum
            jax.ShapeDtypeStruct((N, 1, C), jnp.float32),   # per-item channel sumsq
        ),
        grid=(steps,),
        in_specs=[
            pl.BlockSpec((1, items, H, W, C), lambda i: (0, i, 0, 0, 0)),
            pl.BlockSpec((1, items, H, W, C), lambda i: (1, i, 0, 0, 0)),
            pl.BlockSpec((3, 3, Cin, C), lambda i: (0, 0, 0, 0)),
            pl.BlockSpec((1, C), lambda i: (0, 0)),
        ],
        out_specs=(
            pl.BlockSpec((items, H, W, C), lambda i: (i, 0, 0, 0)),
            pl.BlockSpec((items, 1, C), lambda i: (i, 0, 0)),
            pl.BlockSpec((items, 1, C), lambda i: (i, 0, 0)),
        ),
        scratch_shapes=[pltpu.VMEM((H + 2, W + 2, Cin), jnp.float32)],
        compiler_params=pltpu.CompilerParams(dimension_semantics=("parallel",)),
    )(att, att, w, b)


# ---------------------------------------------------------------------------
# CBAM kernel: BN apply + ReLU, channel-attention MLP, and the 7x7 spatial
# conv expressed as a single (HW, 2HW)@(2HW, 1) MXU matmul.
# ---------------------------------------------------------------------------
def _cbam_kernel(y_ref, bns_ref, bnb_ref, fc1w_ref, fc1b_ref, fc2w_ref,
                 fc2b_ref, mt_ref, b7_ref, out_ref):
    items, H, W, C = y_ref.shape
    HW = H * W
    bns, bnb = bns_ref[...], bnb_ref[...]
    fc1w, fc1b = fc1w_ref[...], fc1b_ref[...]
    fc2w, fc2b = fc2w_ref[...], fc2b_ref[...]
    mt = mt_ref[...]                                          # (HW, 2HW)
    b7 = b7_ref[0]

    def mlp(v):
        h = jnp.maximum(
            jnp.dot(v, fc1w, preferred_element_type=jnp.float32) + fc1b, 0.0)
        return jnp.dot(h, fc2w, preferred_element_type=jnp.float32) + fc2b

    for i in range(items):
        # BatchNorm apply (precomputed per-channel scale/shift) + ReLU
        x = jnp.maximum(y_ref[i].reshape(HW, C) * bns + bnb, 0.0)

        # ---- channel attention ----
        avg_c = jnp.mean(x, axis=0, keepdims=True)            # (1, C)
        max_c = jnp.max(x, axis=0, keepdims=True)             # (1, C)
        ch_scale = _sigmoid(mlp(avg_c) + mlp(max_c))          # (1, C)
        xs = x * ch_scale                                     # (HW, C)

        # ---- spatial attention: 7x7 conv as one matmul (zero-pad folded
        #      into the precomputed matrix, so no padded scratch needed) ----
        mean_col = jnp.mean(xs, axis=1, keepdims=True)        # (HW, 1)
        max_col = jnp.max(xs, axis=1, keepdims=True)          # (HW, 1)
        maps = jnp.concatenate([mean_col, max_col], axis=0)   # (2HW, 1)
        sp = jnp.dot(mt, maps, preferred_element_type=jnp.float32) + b7
        sp_scale = _sigmoid(sp)                               # (HW, 1)

        out_ref[i] = (xs * sp_scale).reshape(H, W, C)


def cbam(y, bns, bnb, fc1w_t, fc1b, fc2w_t, fc2b, mt, b7, *, items):
    N, H, W, C = y.shape
    HID = fc1w_t.shape[-1]
    HW = H * W
    steps = N // items

    def full(shape):
        return pl.BlockSpec(shape, lambda i: (0,) * len(shape))

    return pl.pallas_call(
        _cbam_kernel,
        out_shape=jax.ShapeDtypeStruct((N, H, W, C), jnp.float32),
        grid=(steps,),
        in_specs=[
            pl.BlockSpec((items, H, W, C), lambda i: (i, 0, 0, 0)),
            full((1, C)), full((1, C)),
            full((C, HID)), full((1, HID)),
            full((HID, C)), full((1, C)),
            full((HW, 2 * HW)),
            pl.BlockSpec(memory_space=pltpu.MemorySpace.SMEM),
        ],
        out_specs=pl.BlockSpec((items, H, W, C), lambda i: (i, 0, 0, 0)),
        compiler_params=pltpu.CompilerParams(dimension_semantics=("parallel",)),
    )(y, bns, bnb, fc1w_t, fc1b, fc2w_t, fc2b, mt, b7)


# ---------------------------------------------------------------------------
# Glue: build the "7x7 conv as matrix" operand for the CBAM spatial attention.
# MT[h*W+w, c*HW + y*W+x] = w7[0, c, y-h+3, x-w+3] if the tap is in range, 0
# otherwise (i.e. zero padding is folded into the matrix).
# ---------------------------------------------------------------------------
def build_spatial_matrix(w7, H, W):
    wc = w7[0]                                # (2, 7, 7)
    K = wc.shape[-1]
    P = K // 2
    hh = jnp.arange(H)
    ww = jnp.arange(W)
    kh = hh[None, :] - hh[:, None] + P        # [h, y]
    kw = ww[None, :] - ww[:, None] + P        # [w, x]
    vy = (kh >= 0) & (kh < K)
    vx = (kw >= 0) & (kw < K)
    khc = jnp.clip(kh, 0, K - 1)
    kwc = jnp.clip(kw, 0, K - 1)
    # M[c, h, w, y, x]
    M = wc[:, khc[:, None, :, None], kwc[None, :, None, :]]
    mask = vy[:, None, :, None] & vx[None, :, None, :]
    M = jnp.where(mask[None], M, 0.0)
    return jnp.transpose(M, (1, 2, 0, 3, 4)).reshape(H * W, 2 * H * W)


# ---------------------------------------------------------------------------
# Full FeatureFusionModule forward built from the kernels above
# ---------------------------------------------------------------------------
def feature_fusion_pallas(img_feat, depth_feat, p, *, eps=1e-5):
    B, S, C, H, W = img_feat.shape
    N, HW = B * S, H * W

    # TODO(synk): fold the NCHW<->channels-last boundary transposes into the
    # kernels; they remain plain-XLA transposes at the module boundary.
    def to_seq(x):  # (B,S,C,H,W) -> (N, HW, C)
        return x.reshape(N, C, HW).transpose(0, 2, 1)

    feats = jnp.stack([to_seq(img_feat), to_seq(depth_feat)], axis=0)  # (2,N,HW,C)

    wq_t = p["wq"].T
    wkv_t = jnp.concatenate([p["wk"].T, p["wv"].T], axis=1)            # (C, 2C)
    bq = p["bq"][None]
    bkv = jnp.concatenate([p["bk"], p["bv"]])[None]                    # (1, 2C)

    att = dual_cross_attention(feats, wq_t, bq, wkv_t, bkv, p["gamma"], H=H, W=W)
    # att: (2, N, H, W, C); side 0 = img-query, side 1 = depth-query

    items = 2 if N % 2 == 0 else 1          # >= 2 parallel grid steps for v7x
    wf_k = jnp.transpose(p["wf"], (2, 3, 1, 0))                        # (3,3,2C,C)
    conv_out, csum, cssq = fusion_conv3x3(att, wf_k, p["bf"][None], items=items)

    # BatchNorm2d (training-mode batch statistics): per-item sums come from
    # the conv kernel; only the tiny cross-item reduction happens in glue.
    cnt = N * H * W
    mean = jnp.sum(csum, axis=(0, 1)) / cnt
    var = jnp.sum(cssq, axis=(0, 1)) / cnt - mean * mean
    bns = p["bn_w"] * lax.rsqrt(var + eps)
    bnb = p["bn_b"] - mean * bns

    mt = build_spatial_matrix(p["w7"], H, W)                           # (HW, 2HW)

    out_cl = cbam(conv_out, bns[None], bnb[None],
                  p["fc1_w"].T, p["fc1_b"][None],
                  p["fc2_w"].T, p["fc2_b"][None],
                  mt, p["b7"], items=items)

    return out_cl.reshape(B, S, H, W, C).transpose(0, 1, 4, 2, 3)      # (B,S,C,H,W)


# ---------------------------------------------------------------------------
# Pure-JAX reference (mirrors the PyTorch forward, NCHW)
# ---------------------------------------------------------------------------
def feature_fusion_reference(img_feat, depth_feat, p, *, eps=1e-5):
    B, S, C, H, W = img_feat.shape
    N, HW = B * S, H * W
    gamma = p["gamma"][0]

    def ca(q_in, kv_in):  # (N,C,H,W)
        q = jnp.einsum('oi,nihw->nohw', p["wq"], q_in) + p["bq"][None, :, None, None]
        k = jnp.einsum('oi,nihw->nohw', p["wk"], kv_in) + p["bk"][None, :, None, None]
        v = jnp.einsum('oi,nihw->nohw', p["wv"], kv_in) + p["bv"][None, :, None, None]
        qf, kf, vf = (t.reshape(N, C, HW) for t in (q, k, v))
        att = jax.nn.softmax(jnp.einsum('nip,njp->nij', qf, kf), axis=-1)
        out = jnp.einsum('nij,njp->nip', att, vf).reshape(N, C, H, W)
        return gamma * out + q_in

    img_n = img_feat.reshape(N, C, H, W)
    dep_n = depth_feat.reshape(N, C, H, W)
    fused = jnp.concatenate([ca(img_n, dep_n), ca(dep_n, img_n)], axis=1)

    y = lax.conv_general_dilated(fused, p["wf"], (1, 1), ((1, 1), (1, 1)),
                                 dimension_numbers=('NCHW', 'OIHW', 'NCHW'))
    y = y + p["bf"][None, :, None, None]
    m = jnp.mean(y, axis=(0, 2, 3))
    v = jnp.var(y, axis=(0, 2, 3))
    y = (y - m[None, :, None, None]) / jnp.sqrt(v[None, :, None, None] + eps)
    y = jnp.maximum(y * p["bn_w"][None, :, None, None] + p["bn_b"][None, :, None, None], 0.0)

    # CBAM
    avg_c, max_c = jnp.mean(y, axis=(2, 3)), jnp.max(y, axis=(2, 3))

    def mlp(x):
        h = jnp.maximum(x @ p["fc1_w"].T + p["fc1_b"], 0.0)
        return h @ p["fc2_w"].T + p["fc2_b"]

    y = y * _sigmoid(mlp(avg_c) + mlp(max_c))[:, :, None, None]
    sp_in = jnp.stack([jnp.mean(y, axis=1), jnp.max(y, axis=1)], axis=1)
    sp = lax.conv_general_dilated(sp_in, p["w7"], (1, 1), ((3, 3), (3, 3)),
                                  dimension_numbers=('NCHW', 'OIHW', 'NCHW'))
    y = y * _sigmoid(sp + p["b7"][None, :, None, None])
    return y.reshape(B, S, C, H, W)


if __name__ == "__main__":
    B, S, C, H, W = 2, 2, 16, 8, 8
    R = 8
    HID = C // R

    key = jax.random.PRNGKey(0)
    ks = jax.random.split(key, 20)

    def rnd(k, shape, scale=0.1):
        return scale * jax.random.normal(k, shape, jnp.float32)

    img_feat = rnd(ks[0], (B, S, C, H, W), 1.0)
    depth_feat = rnd(ks[1], (B, S, C, H, W), 1.0)

    params = {
        # CrossAttention (single module shared by both calls)
        "wq": rnd(ks[2], (C, C)), "bq": rnd(ks[3], (C,)),
        "wk": rnd(ks[4], (C, C)), "bk": rnd(ks[5], (C,)),
        "wv": rnd(ks[6], (C, C)), "bv": rnd(ks[7], (C,)),
        "gamma": jnp.full((1,), 0.25, jnp.float32),  # torch init is 0; nonzero to exercise path
        # fusion conv + BN
        "wf": rnd(ks[8], (C, 2 * C, 3, 3)), "bf": rnd(ks[9], (C,)),
        "bn_w": 1.0 + rnd(ks[10], (C,)), "bn_b": rnd(ks[11], (C,)),
        # CBAM
        "fc1_w": rnd(ks[12], (HID, C)), "fc1_b": rnd(ks[13], (HID,)),
        "fc2_w": rnd(ks[14], (C, HID)), "fc2_b": rnd(ks[15], (C,)),
        "w7": rnd(ks[16], (1, 2, 7, 7)), "b7": rnd(ks[17], (1,)),
    }

    out = feature_fusion_pallas(img_feat, depth_feat, params)
    out = jax.block_until_ready(out)

    ref = feature_fusion_reference(img_feat, depth_feat, params)
    assert out.shape == (B, S, C, H, W)
    max_err = float(jnp.max(jnp.abs(out - ref)))
    # Tolerance is slightly looser than f32 exact because the softmax uses the
    # approximate EUP reciprocal (per perf feedback).
    assert max_err < 2e-3, f"mismatch vs reference: max abs err {max_err}"

    print("KERNEL_OK")
</pallas_src>

<mosaic_0001>
module attributes {stable_mosaic.version = 11 : i64} {
  func.func @_dual_cross_attention_kernel(%arg0: i32, %arg1: memref<1x4x64x16xf32, #tpu.memory_space<vmem>>, %arg2: memref<1x4x64x16xf32, #tpu.memory_space<vmem>>, %arg3: memref<16x16xf32, #tpu.memory_space<vmem>>, %arg4: memref<1x16xf32, #tpu.memory_space<vmem>>, %arg5: memref<16x32xf32, #tpu.memory_space<vmem>>, %arg6: memref<1x32xf32, #tpu.memory_space<vmem>>, %arg7: memref<1xf32, #tpu.memory_space<smem>>, %arg8: memref<1x4x8x8x16xf32, #tpu.memory_space<vmem>>) attributes {dimension_semantics = [#tpu.dimension_semantics<parallel>], iteration_bounds = array<i64: 2>, scalar_prefetch = 0 : i64, scratch_operands = 0 : i64, tpu.core_type = #tpu.core_type<tc>, window_params = [{transform_indices = @transform_0, window_bounds = array<i64: 1, 4, 64, 16>}, {transform_indices = @transform_1, window_bounds = array<i64: 1, 4, 64, 16>}, {pipeline_mode = #tpu.pipeline_mode<synchronous>, transform_indices = @transform_2, window_bounds = array<i64: 16, 16>}, {pipeline_mode = #tpu.pipeline_mode<synchronous>, transform_indices = @transform_3, window_bounds = array<i64: 1, 16>}, {pipeline_mode = #tpu.pipeline_mode<synchronous>, transform_indices = @transform_4, window_bounds = array<i64: 16, 32>}, {pipeline_mode = #tpu.pipeline_mode<synchronous>, transform_indices = @transform_5, window_bounds = array<i64: 1, 32>}, {transform_indices = @transform_6, window_bounds = array<i64: 1>}, {transform_indices = @transform_7, window_bounds = array<i64: 1, 4, 8, 8, 16>}]} {
    %c0 = arith.constant 0 : index
    %c0_0 = arith.constant 0 : index
    %c0_1 = arith.constant 0 : index
    %c0_2 = arith.constant 0 : index
    %0 = vector.load %arg1[%c0, %c0_0, %c0_1, %c0_2] : memref<1x4x64x16xf32, #tpu.memory_space<vmem>>, vector<1x4x64x16xf32>
    %1 = vector.shape_cast %0 : vector<1x4x64x16xf32> to vector<4x64x16xf32>
    %c0_3 = arith.constant 0 : index
    %c0_4 = arith.constant 0 : index
    %c0_5 = arith.constant 0 : index
    %c0_6 = arith.constant 0 : index
    %2 = vector.load %arg2[%c0_3, %c0_4, %c0_5, %c0_6] : memref<1x4x64x16xf32, #tpu.memory_space<vmem>>, vector<1x4x64x16xf32>
    %3 = vector.shape_cast %2 : vector<1x4x64x16xf32> to vector<4x64x16xf32>
    %4 = vector.shape_cast %1 : vector<4x64x16xf32> to vector<256x16xf32>
    %5 = vector.shape_cast %3 : vector<4x64x16xf32> to vector<256x16xf32>
    %c0_7 = arith.constant 0 : index
    %c0_8 = arith.constant 0 : index
    %6 = vector.load %arg3[%c0_7, %c0_8] : memref<16x16xf32, #tpu.memory_space<vmem>>, vector<16x16xf32>
    %cst = arith.constant dense<0.000000e+00> : vector<256x16xf32>
    %7 = tpu.matmul %4, %6, %cst {dimension_numbers = #tpu.dot_dimension_numbers<[1], [0], [0], [1], [0, 0, 1, 1], [], []>} : vector<256x16xf32>, vector<16x16xf32>, vector<256x16xf32> -> vector<256x16xf32>
    %c0_9 = arith.constant 0 : index
    %c0_10 = arith.constant 0 : index
    %8 = vector.load %arg4[%c0_9, %c0_10] : memref<1x16xf32, #tpu.memory_space<vmem>>, vector<1x16xf32>
    %9 = vector.broadcast %8 : vector<1x16xf32> to vector<256x16xf32>
    %10 = arith.addf %7, %9 : vector<256x16xf32>
    %11 = vector.shape_cast %10 : vector<256x16xf32> to vector<4x64x16xf32>
    %c0_11 = arith.constant 0 : index
    %c0_12 = arith.constant 0 : index
    %12 = vector.load %arg5[%c0_11, %c0_12] : memref<16x32xf32, #tpu.memory_space<vmem>>, vector<16x32xf32>
    %cst_13 = arith.constant dense<0.000000e+00> : vector<256x32xf32>
    %13 = tpu.matmul %5, %12, %cst_13 {dimension_numbers = #tpu.dot_dimension_numbers<[1], [0], [0], [1], [0, 0, 1, 1], [], []>} : vector<256x16xf32>, vector<16x32xf32>, vector<256x32xf32> -> vector<256x32xf32>
    %c0_14 = arith.constant 0 : index
    %c0_15 = arith.constant 0 : index
    %14 = vector.load %arg6[%c0_14, %c0_15] : memref<1x32xf32, #tpu.memory_space<vmem>>, vector<1x32xf32>
    %15 = vector.broadcast %14 : vector<1x32xf32> to vector<256x32xf32>
    %16 = arith.addf %13, %15 : vector<256x32xf32>
    %17 = vector.extract_strided_slice %16 {offsets = [0, 0], sizes = [256, 16], strides = [1, 1]} : vector<256x32xf32> to vector<256x16xf32>
    %18 = vector.shape_cast %17 : vector<256x16xf32> to vector<4x64x16xf32>
    %19 = vector.extract_strided_slice %16 {offsets = [0, 16], sizes = [256, 16], strides = [1, 1]} : vector<256x32xf32> to vector<256x16xf32>
    %20 = vector.shape_cast %19 : vector<256x16xf32> to vector<4x64x16xf32>
    %cst_16 = arith.constant dense<0.000000e+00> : vector<4x16x16xf32>
    %21 = tpu.matmul %11, %18, %cst_16 {dimension_numbers = #tpu.dot_dimension_numbers<[1], [1], [2], [2], [0, 0, 0, 2, 1, 2], [0], [0]>} : vector<4x64x16xf32>, vector<4x64x16xf32>, vector<4x16x16xf32> -> vector<4x16x16xf32>
    %cst_17 = arith.constant dense<0xFF800000> : vector<4x16xf32>
    %22 = vector.multi_reduction <maximumf>, %21, %cst_17 [2] : vector<4x16x16xf32> to vector<4x16xf32>
    %23 = vector.shape_cast %22 : vector<4x16xf32> to vector<4x16x1xf32>
    %24 = vector.broadcast %23 : vector<4x16x1xf32> to vector<4x16x16xf32>
    %25 = arith.subf %21, %24 : vector<4x16x16xf32>
    %26 = math.exp %25 : vector<4x16x16xf32>
    %cst_18 = arith.constant dense<0.000000e+00> : vector<4x16xf32>
    %27 = vector.multi_reduction <add>, %26, %cst_18 [2] : vector<4x16x16xf32> to vector<4x16xf32>
    %28 = vector.shape_cast %27 : vector<4x16xf32> to vector<4x16x1xf32>
    %29 = tpu.reciprocal %28 {approx = true} : vector<4x16x1xf32> -> vector<4x16x1xf32>
    %30 = vector.broadcast %29 : vector<4x16x1xf32> to vector<4x16x16xf32>
    %31 = arith.mulf %26, %30 : vector<4x16x16xf32>
    %cst_19 = arith.constant dense<0.000000e+00> : vector<4x64x16xf32>
    %32 = tpu.matmul %20, %31, %cst_19 {dimension_numbers = #tpu.dot_dimension_numbers<[2], [2], [1], [1], [0, 0, 0, 1, 1, 1], [0], [0]>} : vector<4x64x16xf32>, vector<4x16x16xf32>, vector<4x64x16xf32> -> vector<4x64x16xf32>
    %c0_20 = arith.constant 0 : index
    %33 = memref.load %arg7[%c0_20] : memref<1xf32, #tpu.memory_space<smem>>
    %34 = vector.broadcast %33 : f32 to vector<4x64x16xf32>
    %35 = arith.mulf %34, %32 : vector<4x64x16xf32>
    %36 = arith.addf %35, %1 : vector<4x64x16xf32>
    %37 = vector.shape_cast %36 : vector<4x64x16xf32> to vector<4x8x8x16xf32>
    %c0_21 = arith.constant 0 : index
    %c0_22 = arith.constant 0 : index
    %c0_23 = arith.constant 0 : index
    %c0_24 = arith.constant 0 : index
    %c0_25 = arith.constant 0 : index
    %38 = vector.load %arg8[%c0_21, %c0_22, %c0_23, %c0_24, %c0_25] : memref<1x4x8x8x16xf32, #tpu.memory_space<vmem>>, vector<1x4x8x8x16xf32>
    %39 = vector.shape_cast %38 : vector<1x4x8x8x16xf32> to vector<4x8x8x16xf32>
    %40 = vector.shape_cast %37 : vector<4x8x8x16xf32> to vector<1x4x8x8x16xf32>
    tpu.vector_store %arg8[%c0_21, %c0_22, %c0_23, %c0_24, %c0_25], %40 {strides = array<i32>} : memref<1x4x8x8x16xf32, #tpu.memory_space<vmem>>, vector<1x4x8x8x16xf32>,
    return
  }
  func.func @transform_0(%arg0: i32) -> (i32, i32, i32, i32) {
    %c0_i32 = arith.constant 0 : i32
    %c0_i32_0 = arith.constant 0 : i32
    %c0_i32_1 = arith.constant 0 : i32
    %c0_i32_2 = arith.constant 0 : i32
    return %arg0, %c0_i32, %c0_i32_0, %c0_i32_1 : i32, i32, i32, i32
  }
  func.func @transform_1(%arg0: i32) -> (i32, i32, i32, i32) {
    %c1_i32 = arith.constant 1 : i32
    %0 = arith.subi %c1_i32, %arg0 : i32
    %c0_i32 = arith.constant 0 : i32
    %c0_i32_0 = arith.constant 0 : i32
    %c0_i32_1 = arith.constant 0 : i32
    %c0_i32_2 = arith.constant 0 : i32
    return %0, %c0_i32, %c0_i32_0, %c0_i32_1 : i32, i32, i32, i32
  }
  func.func @transform_2(%arg0: i32) -> (i32, i32) {
    %c0_i32 = arith.constant 0 : i32
    %c0_i32_0 = arith.constant 0 : i32
    %c0_i32_1 = arith.constant 0 : i32
    return %c0_i32, %c0_i32_0 : i32, i32
  }
  func.func @transform_3(%arg0: i32) -> (i32, i32) {
    %c0_i32 = arith.constant 0 : i32
    %c0_i32_0 = arith.constant 0 : i32
    %c0_i32_1 = arith.constant 0 : i32
    return %c0_i32, %c0_i32_0 : i32, i32
  }
  func.func @transform_4(%arg0: i32) -> (i32, i32) {
    %c0_i32 = arith.constant 0 : i32
    %c0_i32_0 = arith.constant 0 : i32
    %c0_i32_1 = arith.constant 0 : i32
    return %c0_i32, %c0_i32_0 : i32, i32
  }
  func.func @transform_5(%arg0: i32) -> (i32, i32) {
    %c0_i32 = arith.constant 0 : i32
    %c0_i32_0 = arith.constant 0 : i32
    %c0_i32_1 = arith.constant 0 : i32
    return %c0_i32, %c0_i32_0 : i32, i32
  }
  func.func @transform_6(%arg0: i32) -> i32 {
    %c0_i32 = arith.constant 0 : i32
    %c0_i32_0 = arith.constant 0 : i32
    return %c0_i32 : i32
  }
  func.func @transform_7(%arg0: i32) -> (i32, i32, i32, i32, i32) {
    %c0_i32 = arith.constant 0 : i32
    %c0_i32_0 = arith.constant 0 : i32
    %c0_i32_1 = arith.constant 0 : i32
    %c0_i32_2 = arith.constant 0 : i32
    %c0_i32_3 = arith.constant 0 : i32
    return %arg0, %c0_i32, %c0_i32_0, %c0_i32_1, %c0_i32_2 : i32, i32, i32, i32, i32
  }
}

</mosaic_0001>

<bundles_post_ra>
// kernel: tpu_custom_call.1
= control target key start
LH: loop header
LB: loop body
LE: loop exit
PB: predicated region body
PF: predicated region fallthrough
CT: control target
= control target key end

     0   :  { %s3998_s0 = inlined_call_operand.vmem [shape: f32[2,4,64,16], index: 0, kind: input, shape index: {}]   ;;  %s3999_s1 = inlined_call_operand.vmem [shape: f32[2,4,64,16], index: 1, kind: input, shape index: {}]   ;;  %s4000_s2 = inlined_call_operand.vmem [shape: f32[16,16], index: 2, kind: input, shape index: {}]   ;;  %s4001_s3 = inlined_call_operand.vmem [shape: f32[1,16], index: 3, kind: input, shape index: {}]   ;;  %s4002_s4 = inlined_call_operand.vmem [shape: f32[16,32], index: 4, kind: input, shape index: {}]   ;;  %s4003_s5 = inlined_call_operand.vmem [shape: f32[1,32], index: 5, kind: input, shape index: {}]   ;;  %s4004_s6 = inlined_call_operand.<no memory space> [shape: f32[1], index: 6, kind: input, shape index: {}]   ;;  %s4005_s7 = inlined_call_operand.hbm [shape: f32[2,4,8,8,16], index: 7, kind: output, shape index: {}]  }
   0x1   :  { %12 = sst [smem:[#allocation2]] %s4004_s6 }
   0x2   :  { %13 = vsyncpa [#allocation4], 0 }
   0x3   :  { %15 = vsyncpa [#allocation4 + $0x1], 0  ;;  %s3198_s26 = smov 0   ;;  %s3200_s27 = smov 0  }
   0x4   :  { %s3202_s28 = smov 0   ;;  %s3204_s29 = smov 0  }
   0x5 LB: > { %s3219_s6 = sadd.s32 4294967295, %s3149_s29   ;;  %s2361_s30 = sadd.s32 4294967294, %s3149_s29   ;;  %s3149_s29 = sphi %s3204_s29, %s4013_s29   ;;  %s3145_s28 = sphi %s3202_s28, %s4012_s28   ;;  %s3141_s27 = sphi %s3200_s27, %s4011_s27   ;;  %s3137_s26 = sphi %s3198_s26, %s4010_s26  }
   0x6   : > { %s3223_s8 = sadd.s32 1, %s3149_s29   ;;  %s187_s9 = sadd.s32 1, %s3145_s28 }
   0x7   : > { %s184_s10 = ssub.s32 %s3149_s29, %s3223_s8  ;;  %p197_p0 = scmp.ne.s32.totalorder %s3145_s28, %s3141_s27 }
   0x8   : > { %p185_p1 = scmp.eq.s32.totalorder %s184_s10, 0  ;;  %p198_p2 = scmp.eq.s32.totalorder %s3219_s6, 1 }
   0x9   : > { %p203_p3 = scmp.ne.s32.totalorder %s3141_s27, %s3137_s26  ;;  %p204_p4 = scmp.eq.s32.totalorder %s2361_s30, 1 }
   0xa   : > { %s3234_s11 = scalar_select %p185_p1, %s3145_s28, %s187_s9  }
   0xb   : > { %p3236_p5 = por %p198_p2, %p197_p0  ;;  %p3240_p6 = por %p204_p4, %p203_p3 }
   0xc   : > { %p2364_p7 = scmp.ge.s32.totalorder %s3149_s29, 1  ;;  %p255_p8 = scmp.lt.s32.totalorder %s3149_s29, 3 }
   0xe   : > { %p256_p9 = pnand %p2364_p7, %p255_p8 }
   0xf   : > { %v369_v0 = vld [vmem:[%s4000_s2] sm:$0xff] (!%p256_p9)  ;;  %v370_v1 = vld [vmem:[%s4000_s2 + $0x8] sm:$0xff] (!%p256_p9)  ;;  %p293_p10 = scmp.lt.s32.totalorder (!%p256_p9), %s3219_s6, 1  ;;  %s298_s20 = ssub.s32 (!%p256_p9), 1, %s3219_s6  ;;  %vm378_vm0 = vcmask (!%p256_p9), 130048   ;;  %vm1062_vm1 = vcmask (!%p256_p9), 523264  }
  0x10   : > { %259 = sbr.rel (%p256_p9) target bundleno = 1234 (0x4d2), region = 48  ;;  %v700_v2 = vld [vmem:[%s4002_s4] sm:$0xff] (!%p256_p9)  ;;  %v2884_v3 = vpack.c.bf16 (!%p256_p9), %v370_v1, %v369_v0  ;;  %v701_v4 = vld [vmem:[%s4002_s4 + $0x8] sm:$0xff] (!%p256_p9)  ;;  %p299_p11 = scmp.lt.s32.totalorder (!%p256_p9), %s298_s20, 1  ;;  %vm3739_vm2 = vmpackc.low (!%p256_p9), %vm378_vm0, %vm378_vm0 }
  0x11   : > { %v2888_v5 = vpack.c.bf16 (!%p256_p9), %v701_v4, %v700_v2  ;;  %s3151_s21 = smov (!%p256_p9), 112   ;;  %s2175_s22 = sld [smem:[#allocation2]] (!%p256_p9) }
  0x12   : > { %2885 = vmatprep.subr.bf16.mxu0 (!%p256_p9), %v2884_v3  ;;  %s2491_s30 = sshll.u32 (!%p256_p9), %s3219_s6, 12  ;;  %s3152_s18 = smov (!%p256_p9), [#allocation3]  }
  0x13   : > { %2887 = vmatpush3.bf16.msra.mxu0 (!%p256_p9), %v2884_v3  ;;  %2889 = vmatprep.subr.bf16.mxu1 (!%p256_p9), %v2888_v5  ;;  %s3946_s15 = scalar_lea.hbm (!%p256_p9), %s4005_s7, %s2491_s30  ;;  %s3091_s19 = sshll.u32 (!%p256_p9), %s3152_s18, 4  ;;  %s3092_s19 = int_to_ptr.vmem [resolvable:$false] %s3091_s19 }
  0x14   : > { %2891 = vmatpush3.bf16.msra.mxu1 (!%p256_p9), %v2888_v5 }
  0x17   : > { %s294_s23 = scalar_select %p293_p10, %s3219_s6, 1 }
  0x18   : > { %s4015_s20 = smov (!%p299_p11, %s298_s20), 1 }
  0x19   : > { %s2489_s24 = sshll.u32 %s294_s23, 8  ;;  %s2490_s10 = sshll.u32 %s4015_s20, 8 }
  0x1a   : > { %s3264_s9 = scalar_lea.vmem %s3998_s0, %s2489_s24  ;;  %s3280_s16 = scalar_lea.vmem %s3999_s1, %s2490_s10 }
  0x1b   : > { %v305_v6 = vld [vmem:[%s3264_s9] sm:$0xff]  ;;  %v306_v7 = vld [vmem:[%s3264_s9 + $0x8] sm:$0xff]  ;;  %v307_v8 = vld [vmem:[%s3264_s9 + $0x10] sm:$0xff]  ;;  %s290_s23 = sand.u32 1, %s3141_s27   ;;  %s3093_s20 = scalar_lea.vmem %s3092_s19, 8192 }
  0x1c   : > { %2644 = vmatprep.mubr.msk.f32.mxu0 %vm378_vm0, %v305_v6  ;;  %v308_v9 = vld [vmem:[%s3264_s9 + $0x18] sm:$0xff]  ;;  %v309_v10 = vld [vmem:[%s3264_s9 + $0x20] sm:$0xff]  ;;  %v310_v11 = vld [vmem:[%s3264_s9 + $0x28] sm:$0xff]  ;;  %s2365_s24 = sshll.u32 %s290_s23, 8 }
  0x1d   : > { %2645 = vmatmul.mubr.msk.f32.vlgmr.msra.gmra.mrb[0].mxu0 %vm378_vm0, %v306_v7  ;;  %v311_v12 = vld [vmem:[%s3264_s9 + $0x30] sm:$0xff]  ;;  %v337_v13 = vld [vmem:[%s3280_s16] sm:$0xff]  ;;  %v312_v14 = vld [vmem:[%s3264_s9 + $0x38] sm:$0xff]  ;;  %s3820_s25 = scalar_lea.vmem [#allocation3], %s2365_s24 }
  0x1e   : > { %2647 = vmatprep.mubr.msk.f32.mxu0 %vm378_vm0, %v307_v8  ;;  %2696 = vmatprep.mubr.msk.f32.mxu1 %vm378_vm0, %v337_v13  ;;  %v338_v15 = vld [vmem:[%s3280_s16 + $0x8] sm:$0xff]  ;;  %v339_v16 = vld [vmem:[%s3280_s16 + $0x10] sm:$0xff]  ;;  %v313_v17 = vld [vmem:[%s3264_s9 + $0x40] sm:$0xff]  ;;  %s2287_s10 = sshll.u32 %s3820_s25, 4  ;;  %s3948_s10 = int_to_ptr.vmem [resolvable:$true] %s2287_s10 }
  0x1f   : > { %2697 = vmatmul.mubr.msk.f32.vlgmr.msra.gmra.mrb[0].mxu1 %vm378_vm0, %v338_v15  ;;  %v340_v18 = vld [vmem:[%s3280_s16 + $0x18] sm:$0xff]  ;;  %v341_v19 = vld [vmem:[%s3280_s16 + $0x20] sm:$0xff]  ;;  %v314_v20 = vld [vmem:[%s3264_s9 + $0x48] sm:$0xff]  ;;  %s3087_s17 = scalar_lea.vmem %s3948_s10, 4096  ;;  %p3094_p1 = scmp.lt.s32.totalorder %s3948_s10, %s3092_s19 }
  0x20   : > { %2699 = vmatprep.mubr.msk.f32.mxu1 %vm378_vm0, %v339_v16  ;;  %v315_v21 = vld [vmem:[%s3264_s9 + $0x50] sm:$0xff]  ;;  %v342_v22 = vld [vmem:[%s3280_s16 + $0x28] sm:$0xff]  ;;  %v316_v24 = vld [vmem:[%s3264_s9 + $0x58] sm:$0xff]  ;;  %p3088_p12 = scmp.ne.s32.totalorder %s3948_s10, %s3087_s17  ;;  %p3095_p2 = scmp.lt.s32.totalorder %s3093_s20, %s3087_s17 }
  0x21   : > { %2648 = vmatmul.mubr.msk.f32.gmra.mrb[2].mxu0 %vm378_vm0, %v308_v9  ;;  %v343_v23 = vld [vmem:[%s3280_s16 + $0x30] sm:$0xff]  ;;  %v317_v25 = vld [vmem:[%s3264_s9 + $0x60] sm:$0xff]  ;;  %v344_v26 = vld [vmem:[%s3280_s16 + $0x38] sm:$0xff] }
  0x22   : > { %2650 = vmatprep.mubr.msk.f32.mxu0 %vm378_vm0, %v309_v10  ;;  %v345_v27 = vld [vmem:[%s3280_s16 + $0x40] sm:$0xff]  ;;  %v318_v28 = vld [vmem:[%s3264_s9 + $0x68] sm:$0xff]  ;;  %v319_v29 = vld [vmem:[%s3264_s9 + $0x70] sm:$0xff]  ;;  %p3089_p13 = pnand %p3088_p12, %p3236_p5  ;;  %p3096_p3 = por %p3095_p2, %p3094_p1 }
  0x23   : > { %2700 = vmatmul.mubr.msk.f32.gmra.mrb[2].mxu1 %vm378_vm0, %v340_v18  ;;  %v346_v30 = vld [vmem:[%s3280_s16 + $0x48] sm:$0xff]  ;;  %v347_v31 = vld [vmem:[%s3280_s16 + $0x50] sm:$0xff]  ;;  %v320_v32 = vld [vmem:[%s3264_s9 + $0x78] sm:$0xff] }
  0x24   : > { %2702 = vmatprep.mubr.msk.f32.mxu1 %vm378_vm0, %v341_v19  ;;  %v321_v33 = vld [vmem:[%s3264_s9 + $0x80] sm:$0xff]  ;;  %v348_v34 = vld [vmem:[%s3280_s16 + $0x58] sm:$0xff]  ;;  %v322_v36 = vld [vmem:[%s3264_s9 + $0x88] sm:$0xff]  ;;  %p3090_p0 = pneg %p3089_p13 }
  0x25   : > { %2651 = vmatmul.mubr.msk.f32.gmra.mrb[4].mxu0 %vm378_vm0, %v310_v11  ;;  %v349_v35 = vld [vmem:[%s3280_s16 + $0x60] sm:$0xff]  ;;  %v323_v37 = vld [vmem:[%s3264_s9 + $0x90] sm:$0xff]  ;;  %v350_v38 = vld [vmem:[%s3280_s16 + $0x68] sm:$0xff] }
  0x26   : > { %2653 = vmatprep.mubr.msk.f32.mxu0 %vm378_vm0, %v311_v12  ;;  %v351_v39 = vld [vmem:[%s3280_s16 + $0x70] sm:$0xff]  ;;  %v324_v40 = vld [vmem:[%s3264_s9 + $0x98] sm:$0xff]  ;;  %v325_v41 = vld [vmem:[%s3264_s9 + $0xa0] sm:$0xff]  ;;  %p3097_p4 = pnand %p3096_p3, %p3090_p0 }
  0x27   : > { %2703 = vmatmul.mubr.msk.f32.gmra.mrb[4].mxu1 %vm378_vm0, %v342_v22  ;;  %v352_v42 = vld [vmem:[%s3280_s16 + $0x78] sm:$0xff]  ;;  %v353_v43 = vld [vmem:[%s3280_s16 + $0x80] sm:$0xff]  ;;  %v326_v44 = vld [vmem:[%s3264_s9 + $0xa8] sm:$0xff] }
  0x28   : > { %2705 = vmatprep.mubr.msk.f32.mxu1 %vm378_vm0, %v343_v23  ;;  %v327_v45 = vld [vmem:[%s3264_s9 + $0xb0] sm:$0xff]  ;;  %v354_v46 = vld [vmem:[%s3280_s16 + $0x88] sm:$0xff]  ;;  %v328_v48 = vld [vmem:[%s3264_s9 + $0xb8] sm:$0xff] }
  0x29   : > { %2654 = vmatmul.mubr.msk.f32.gmra.mrb[6].mxu0 %vm378_vm0, %v312_v14  ;;  %v355_v47 = vld [vmem:[%s3280_s16 + $0x90] sm:$0xff]  ;;  %v329_v49 = vld [vmem:[%s3264_s9 + $0xc0] sm:$0xff]  ;;  %v356_v50 = vld [vmem:[%s3280_s16 + $0x98] sm:$0xff] }
  0x2a   : > { %2656 = vmatprep.mubr.msk.f32.mxu0 %vm378_vm0, %v313_v17  ;;  %v357_v51 = vld [vmem:[%s3280_s16 + $0xa0] sm:$0xff]  ;;  %v330_v52 = vld [vmem:[%s3264_s9 + $0xc8] sm:$0xff]  ;;  %v331_v53 = vld [vmem:[%s3264_s9 + $0xd0] sm:$0xff] }
  0x2b   : > { %2706 = vmatmul.mubr.msk.f32.gmra.mrb[6].mxu1 %vm378_vm0, %v344_v26  ;;  %v358_v54 = vld [vmem:[%s3280_s16 + $0xa8] sm:$0xff]  ;;  %v359_v55 = vld [vmem:[%s3280_s16 + $0xb0] sm:$0xff]  ;;  %v332_v56 = vld [vmem:[%s3264_s9 + $0xd8] sm:$0xff] }
  0x2c   : > { %2708 = vmatprep.mubr.msk.f32.mxu1 %vm378_vm0, %v345_v27  ;;  %v333_v57 = vld [vmem:[%s3264_s9 + $0xe0] sm:$0xff]  ;;  %v360_v58 = vld [vmem:[%s3280_s16 + $0xb8] sm:$0xff]  ;;  %v334_v60 = vld [vmem:[%s3264_s9 + $0xe8] sm:$0xff] }
  0x2d   : > { %2657 = vmatmul.mubr.msk.f32.gmra.mrb[8].mxu0 %vm378_vm0, %v314_v20  ;;  %v361_v59 = vld [vmem:[%s3280_s16 + $0xc0] sm:$0xff]  ;;  %v335_v61 = vld [vmem:[%s3264_s9 + $0xf0] sm:$0xff]  ;;  %v362_v62 = vld [vmem:[%s3280_s16 + $0xc8] sm:$0xff] }
  0x2e   : > { %2659 = vmatprep.mubr.msk.f32.mxu0 %vm378_vm0, %v315_v21  ;;  %v363_v63 = vld [vmem:[%s3280_s16 + $0xd0] sm:$0xff]  ;;  %v336_v0 = vld [vmem:[%s3264_s9 + $0xf8] sm:$0xff]  ;;  %v365_v2 = vld [vmem:[%s3280_s16 + $0xe0] sm:$0xff] }
  0x2f   : > { %2709 = vmatmul.mubr.msk.f32.gmra.mrb[8].mxu1 %vm378_vm0, %v346_v30  ;;  %v364_v1 = vld [vmem:[%s3280_s16 + $0xd8] sm:$0xff]  ;;  %v366_v3 = vld [vmem:[%s3280_s16 + $0xe8] sm:$0xff]  ;;  %v367_v4 = vld [vmem:[%s3280_s16 + $0xf0] sm:$0xff] }
  0x30   : > { %2711 = vmatprep.mubr.msk.f32.mxu1 %vm378_vm0, %v347_v31  ;;  %v368_v5 = vld [vmem:[%s3280_s16 + $0xf8] sm:$0xff]  ;;  %v3402_v6 = vld [vmem:[%s4001_s3] ss:$0 sm:$0xff]  ;;  %s3957_s16 = scalar_lea.sflag [#allocation4], %s290_s23 }
  0x31   : > { %2660 = vmatmul.mubr.msk.f32.gmra.mrb[10].mxu0 %vm378_vm0, %v316_v24  ;;  %v3410_v17 = vld [vmem:[%s4003_s5] ss:$0 sm:$0xff] }
  0x32   : > { %2662 = vmatprep.mubr.msk.f32.mxu0 %vm378_vm0, %v317_v25 }
  0x33   : > { %2712 = vmatmul.mubr.msk.f32.gmra.mrb[10].mxu1 %vm378_vm0, %v348_v34 }
  0x34   : > { %2714 = vmatprep.mubr.msk.f32.mxu1 %vm378_vm0, %v349_v35 }
  0x35   : > { %2663 = vmatmul.mubr.msk.f32.gmra.mrb[12].mxu0 %vm378_vm0, %v318_v28 }
  0x36   : > { %2665 = vmatprep.mubr.msk.f32.mxu0 %vm378_vm0, %v319_v29 }
  0x37   : > { %2715 = vmatmul.mubr.msk.f32.gmra.mrb[12].mxu1 %vm378_vm0, %v350_v38 }
  0x38   : > { %2717 = vmatprep.mubr.msk.f32.mxu1 %vm378_vm0, %v351_v39 }
  0x39   : > { %2666 = vmatmul.mubr.msk.f32.gmra.mrb[14].mxu0 %vm378_vm0, %v320_v32 }
  0x3a   : > { %2668 = vmatprep.mubr.msk.f32.mxu0 %vm378_vm0, %v321_v33 }
  0x3b   : > { %2718 = vmatmul.mubr.msk.f32.gmra.mrb[14].mxu1 %vm378_vm0, %v352_v42 }
  0x3c   : > { %2720 = vmatprep.mubr.msk.f32.mxu1 %vm378_vm0, %v353_v43 }
  0x3d   : > { %2669 = vmatmul.mubr.msk.f32.gmra.mrb[16].mxu0 %vm378_vm0, %v322_v36 }
  0x3e   : > { %2671 = vmatprep.mubr.msk.f32.mxu0 %vm378_vm0, %v323_v37 }
  0x3f   : > { %2721 = vmatmul.mubr.msk.f32.gmra.mrb[16].mxu1 %vm378_vm0, %v354_v46 }
  0x40   : > { %2723 = vmatprep.mubr.msk.f32.mxu1 %vm378_vm0, %v355_v47 }
  0x41   : > { %2672 = vmatmul.mubr.msk.f32.gmra.mrb[18].mxu0 %vm378_vm0, %v324_v40 }
  0x42   : > { %2674 = vmatprep.mubr.msk.f32.mxu0 %vm378_vm0, %v325_v41 }
  0x43   : > { %2724 = vmatmul.mubr.msk.f32.gmra.mrb[18].mxu1 %vm378_vm0, %v356_v50 }
  0x44   : > { %2726 = vmatprep.mubr.msk.f32.mxu1 %vm378_vm0, %v357_v51 }
  0x45   : > { %2675 = vmatmul.mubr.msk.f32.gmra.mrb[20].mxu0 %vm378_vm0, %v326_v44 }
  0x46   : > { %2677 = vmatprep.mubr.msk.f32.mxu0 %vm378_vm0, %v327_v45 }
  0x47   : > { %2727 = vmatmul.mubr.msk.f32.gmra.mrb[20].mxu1 %vm378_vm0, %v358_v54 }
  0x48   : > { %2729 = vmatprep.mubr.msk.f32.mxu1 %vm378_vm0, %v359_v55 }
  0x49   : > { %2678 = vmatmul.mubr.msk.f32.gmra.mrb[22].mxu0 %vm378_vm0, %v328_v48 }
  0x4a   : > { %2680 = vmatprep.mubr.msk.f32.mxu0 %vm378_vm0, %v329_v49 }
  0x4b   : > { %2730 = vmatmul.mubr.msk.f32.gmra.mrb[22].mxu1 %vm378_vm0, %v360_v58 }
  0x4c   : > { %2732 = vmatprep.mubr.msk.f32.mxu1 %vm378_vm0, %v361_v59 }
  0x4d   : > { %2681 = vmatmul.mubr.msk.f32.gmra.mrb[24].mxu0 %vm378_vm0, %v330_v52 }
  0x4e   : > { %2683 = vmatprep.mubr.msk.f32.mxu0 %vm378_vm0, %v331_v53 }
  0x4f   : > { %2733 = vmatmul.mubr.msk.f32.gmra.mrb[24].mxu1 %vm378_vm0, %v362_v62 }
  0x50   : > { %2735 = vmatprep.mubr.msk.f32.mxu1 %vm378_vm0, %v363_v63 }
  0x51   : > { %2684 = vmatmul.mubr.msk.f32.gmra.mrb[26].mxu0 %vm378_vm0, %v332_v56 }
  0x52   : > { %2686 = vmatprep.mubr.msk.f32.mxu0 %vm378_vm0, %v333_v57 }
  0x53   : > { %2736 = vmatmul.mubr.msk.f32.gmra.mrb[26].mxu1 %vm378_vm0, %v364_v1 }
  0x54   : > { %2738 = vmatprep.mubr.msk.f32.mxu1 %vm378_vm0, %v365_v2 }
  0x55   : > { %2687 = vmatmul.mubr.msk.f32.gmra.mrb[28].mxu0 %vm378_vm0, %v334_v60 }
  0x56   : > { %2689 = vmatprep.mubr.msk.f32.mxu0 %vm378_vm0, %v335_v61 }
  0x57   : > { %2739 = vmatmul.mubr.msk.f32.gmra.mrb[28].mxu1 %vm378_vm0, %v366_v3 }
  0x58   : > { %2741 = vmatprep.mubr.msk.f32.mxu1 %vm378_vm0, %v367_v4 }
  0x59   : > { %2690 = vmatmul.mubr.msk.f32.gmra.mrb[30].mxu0 %vm378_vm0, %v336_v0 }
  0x5b   : > { %2742 = vmatmul.mubr.msk.f32.gmra.mrb[30].mxu1 %vm378_vm0, %v368_v5 }
  0xf0   : > { %v2646_v7 = vpop.f32.mrb[0].mxu0 }
  0xf1   : > { %v541_v8 = vpop.f32.mrb[1].mxu0  ;;  %v547_v12 = vadd.f32 %v2646_v7, %v3402_v6 }
  0xf2   : > { %v542_v9 = vadd.f32 %v3402_v6, %v541_v8  ;;  %v2698_v16 = vpop.f32.mrb[0].mxu1 }
  0xf3   : > { %v871_v18 = vpop.f32.mrb[1].mxu1  ;;  %v3413_v20 = vadd.f32 %v2698_v16, %v3410_v17 }
  0xf4   : > { %v2649_v10 = vpop.f32.mrb[2].mxu0  ;;  %1030 = vxpose.xlu0.b32.start [1/8] (short) (narrow) %v542_v9, 16  ;;  %v3416_v21 = vadd.f32 %v3410_v17, %v871_v18 }
  0xf5   : > { %v551_v11 = vpop.f32.mrb[3].mxu0  ;;  %v557_v23 = vadd.f32 %v2649_v10, %v3402_v6 }
  0xf6   : > { %v552_v15 = vadd.f32 %v3402_v6, %v551_v11  ;;  %v2892_v24 = vpack.c.bf16 %v3413_v20, %v3416_v21  ;;  %v2701_v25 = vpop.f32.mrb[2].mxu1 }
  0xf7   : > { %v3422_v26 = vadd.f32 %v2701_v25, %v3410_v17  ;;  %v881_v27 = vpop.f32.mrb[3].mxu1 }
  0xf8   : > { %v2652_v13 = vpop.f32.mrb[4].mxu0  ;;  %1031 = vxpose.xlu0.b32.cont [2/8] (short) (narrow) %v547_v12, 16  ;;  %v3425_v29 = vadd.f32 %v3410_v17, %v881_v27  ;;  %2893 = vmatprep.subr.bf16.mxu0 %v2892_v24 }
  0xf9   : > { %v561_v14 = vpop.f32.mrb[5].mxu0  ;;  %2895 = vmatpush3.bf16.msra.mxu0 %v2892_v24  ;;  %v567_v40 = vadd.f32 %v2652_v13, %v3402_v6 }
  0xfa   : > { %v562_v31 = vadd.f32 %v3402_v6, %v561_v14  ;;  %v2896_v33 = vpack.c.bf16 %v3422_v26, %v3425_v29  ;;  %v2704_v34 = vpop.f32.mrb[4].mxu1 }
  0xfb   : > { %v3432_v35 = vadd.f32 %v2704_v34, %v3410_v17  ;;  %v891_v36 = vpop.f32.mrb[5].mxu1 }
  0xfc   : > { %v2655_v19 = vpop.f32.mrb[6].mxu0  ;;  %1032 = vxpose.xlu0.b32.cont [3/8] (short) (narrow) %v552_v15, 16  ;;  %v3435_v38 = vadd.f32 %v3410_v17, %v891_v36  ;;  %2897 = vmatprep.subr.bf16.mxu0 %v2896_v33 }
  0xfd   : > { %v571_v22 = vpop.f32.mrb[7].mxu0  ;;  %2899 = vmatpush3.bf16.msra.mxu0 %v2896_v33  ;;  %v577_v58 = vadd.f32 %v2655_v19, %v3402_v6 }
  0xfe   : > { %v2900_v42 = vpack.c.bf16 %v3432_v35, %v3435_v38  ;;  %v2707_v43 = vpop.f32.mrb[6].mxu1  ;;  %v572_v50 = vadd.f32 %v3402_v6, %v571_v22 }
  0xff   : > { %v3442_v44 = vadd.f32 %v2707_v43, %v3410_v17  ;;  %v901_v45 = vpop.f32.mrb[7].mxu1 }
 0x100   : > { %v2658_v28 = vpop.f32.mrb[8].mxu0  ;;  %1033 = vxpose.xlu0.b32.cont [4/8] (short) (narrow) %v557_v23, 16  ;;  %v3446_v48 = vadd.f32 %v3410_v17, %v901_v45  ;;  %2901 = vmatprep.subr.bf16.mxu0 %v2900_v42 }
 0x101   : > { %v581_v30 = vpop.f32.mrb[9].mxu0  ;;  %v587_v41 = vadd.f32 %v2658_v28, %v3402_v6  ;;  %2903 = vmatpush3.bf16.msra.mxu0 %v2900_v42 }
 0x102   : > { %v582_v32 = vadd.f32 %v3402_v6, %v581_v30  ;;  %v2904_v51 = vpack.c.bf16 %v3442_v44, %v3446_v48  ;;  %v2710_v52 = vpop.f32.mrb[8].mxu1 }
 0x103   : > { %v911_v53 = vpop.f32.mrb[9].mxu1  ;;  %v3452_v55 = vadd.f32 %v2710_v52, %v3410_v17 }
 0x104   : > { %1144 = vxpose.xlu1.b32.start [1/8] (short) (narrow) %v582_v32, 16  ;;  %1034 = vxpose.xlu0.b32.cont [5/8] (short) (narrow) %v562_v31, 16  ;;  %v2661_v37 = vpop.f32.mrb[10].mxu0  ;;  %v3455_v56 = vadd.f32 %v3410_v17, %v911_v53 }
 0x105   : > { %v591_v39 = vpop.f32.mrb[11].mxu0  ;;  %2905 = vmatprep.subr.bf16.mxu0 %v2904_v51  ;;  %v597_v59 = vadd.f32 %v2661_v37, %v3402_v6 }
 0x106   : > { %v592_v46 = vadd.f32 %v3402_v6, %v591_v39  ;;  %v2908_v60 = vpack.c.bf16 %v3452_v55, %v3455_v56  ;;  %2907 = vmatpush3.bf16.msra.mxu0 %v2904_v51  ;;  %v2713_v61 = vpop.f32.mrb[10].mxu1 }
 0x107   : > { %v921_v62 = vpop.f32.mrb[11].mxu1  ;;  %v3463_v1 = vadd.f32 %v2713_v61, %v3410_v17 }
 0x108   : > { %1145 = vxpose.xlu1.b32.cont [2/8] (short) (narrow) %v587_v41, 16  ;;  %1035 = vxpose.xlu0.b32.cont [6/8] (short) (narrow) %v567_v40, 16  ;;  %v2664_v47 = vpop.f32.mrb[12].mxu0  ;;  %v3466_v2 = vadd.f32 %v3410_v17, %v921_v62 }
 0x109   : > { %v601_v49 = vpop.f32.mrb[13].mxu0  ;;  %2909 = vmatprep.subr.bf16.mxu1 %v2908_v60  ;;  %v607_v14 = vadd.f32 %v2664_v47, %v3402_v6 }
 0x10a   : > { %v602_v63 = vadd.f32 %v3402_v6, %v601_v49  ;;  %2911 = vmatpush3.bf16.msra.mxu1 %v2908_v60  ;;  %v2912_v5 = vpack.c.bf16 %v3463_v1, %v3466_v2  ;;  %v2716_v7 = vpop.f32.mrb[12].mxu1 }
 0x10b   : > { %v931_v8 = vpop.f32.mrb[13].mxu1  ;;  %v3473_v11 = vadd.f32 %v2716_v7, %v3410_v17 }
 0x10c   : > { %1146 = vxpose.xlu1.b32.cont [3/8] (short) (narrow) %v592_v46, 16  ;;  %1036 = vxpose.xlu0.b32.cont [7/8] (short) (narrow) %v572_v50, 16  ;;  %v2667_v54 = vpop.f32.mrb[14].mxu0  ;;  %v3476_v12 = vadd.f32 %v3410_v17, %v931_v8 }
 0x10d   : > { %v611_v57 = vpop.f32.mrb[15].mxu0  ;;  %2913 = vmatprep.subr.bf16.mxu1 %v2912_v5  ;;  %v617_v39 = vadd.f32 %v2667_v54, %v3402_v6 }
 0x10e   : > { %2915 = vmatpush3.bf16.msra.mxu1 %v2912_v5  ;;  %v2916_v15 = vpack.c.bf16 %v3473_v11, %v3476_v12  ;;  %v2719_v16 = vpop.f32.mrb[14].mxu1  ;;  %v612_v22 = vadd.f32 %v3402_v6, %v611_v57 }
 0x10f   : > { %v3482_v18 = vadd.f32 %v2719_v16, %v3410_v17  ;;  %v941_v19 = vpop.f32.mrb[15].mxu1 }
 0x110   : > { %v2670_v0 = vpop.f32.mrb[16].mxu0  ;;  %1147 = vxpose.xlu1.b32.cont [4/8] (short) (narrow) %v597_v59, 16  ;;  %1037 = vxpose.xlu0.b32.end [8/8] (short) (narrow) %v577_v58, 16  ;;  %v3487_v25 = vadd.f32 %v3410_v17, %v941_v19 }
 0x111   : > { %v621_v3 = vpop.f32.mrb[17].mxu0  ;;  %v627_v9 = vadd.f32 %v2670_v0, %v3402_v6  ;;  %2917 = vmatprep.subr.bf16.mxu1 %v2916_v15 }
 0x112   : > { %v622_v4 = vadd.f32 %v3402_v6, %v621_v3  ;;  %2919 = vmatpush3.bf16.msra.mxu1 %v2916_v15  ;;  %v2920_v28 = vpack.c.bf16 %v3482_v18, %v3487_v25  ;;  %v2722_v30 = vpop.f32.mrb[16].mxu1 }
 0x113   : > { %v3492_v31 = vadd.f32 %v2722_v30, %v3410_v17  ;;  %v951_v32 = vpop.f32.mrb[17].mxu1 }
 0x114   : > { %1148 = vxpose.xlu1.b32.cont [5/8] (short) (narrow) %v602_v63, 16  ;;  %1257 = vxpose.xlu0.b32.start [1/8] (short) (narrow) %v622_v4, 16  ;;  %v2673_v10 = vpop.f32.mrb[18].mxu0  ;;  %v3496_v36 = vadd.f32 %v3410_v17, %v951_v32 }
 0x115   : > { %v631_v13 = vpop.f32.mrb[19].mxu0  ;;  %v637_v33 = vadd.f32 %v2673_v10, %v3402_v6  ;;  %2921 = vmatprep.subr.bf16.mxu1 %v2920_v28 }
 0x116   : > { %v632_v23 = vadd.f32 %v3402_v6, %v631_v13  ;;  %2923 = vmatpush3.bf16.msra.mxu1 %v2920_v28  ;;  %v3501_v40 = vpack.c.bf16 %v3492_v31, %v3496_v36  ;;  %v2725_v41 = vpop.f32.mrb[18].mxu1 }
 0x117   : > { %v3504_v42 = vadd.f32 %v2725_v41, %v3410_v17  ;;  %v961_v43 = vpop.f32.mrb[19].mxu1 }
 0x118   : > { %1149 = vxpose.xlu1.b32.cont [6/8] (short) (narrow) %v607_v14, 16  ;;  %1258 = vxpose.xlu0.b32.cont [2/8] (short) (narrow) %v627_v9, 16  ;;  %v2676_v24 = vpop.f32.mrb[20].mxu0  ;;  %v3508_v47 = vadd.f32 %v3410_v17, %v961_v43 }
 0x119   : > { %v641_v27 = vpop.f32.mrb[21].mxu0  ;;  %2925 = vmatprep.subr.bf16.mxu0 %v3501_v40  ;;  %v647_v54 = vadd.f32 %v2676_v24, %v3402_v6 }
 0x11a   : > { %v642_v45 = vadd.f32 %v3402_v6, %v641_v27  ;;  %v2728_v51 = vpop.f32.mrb[20].mxu1 }
 0x11b   : > { %v3513_v52 = vadd.f32 %v2728_v51, %v3410_v17  ;;  %v971_v53 = vpop.f32.mrb[21].mxu1 }
 0x11c   : > { %1150 = vxpose.xlu1.b32.cont [7/8] (short) (narrow) %v612_v22, 16  ;;  %1259 = vxpose.xlu0.b32.cont [3/8] (short) (narrow) %v632_v23, 16  ;;  %v2679_v34 = vpop.f32.mrb[22].mxu0  ;;  %v3518_v59 = vadd.f32 %v3410_v17, %v971_v53 }
 0x11d   : > { %v651_v37 = vpop.f32.mrb[23].mxu0  ;;  %v657_v15 = vadd.f32 %v2679_v34, %v3402_v6 }
 0x11e   : > { %v2731_v61 = vpop.f32.mrb[22].mxu1  ;;  %v652_v0 = vadd.f32 %v3402_v6, %v651_v37 }
 0x11f   : > { %v3521_v62 = vadd.f32 %v2731_v61, %v3410_v17  ;;  %v981_v63 = vpop.f32.mrb[23].mxu1 }
 0x120   : > { %v2682_v46 = vpop.f32.mrb[24].mxu0  ;;  %1151 = vxpose.xlu1.b32.end [8/8] (short) (narrow) %v617_v39, 16  ;;  %1260 = vxpose.xlu0.b32.cont [4/8] (short) (narrow) %v637_v33, 16  ;;  %v3526_v5 = vadd.f32 %v3410_v17, %v981_v63 }
 0x121   : > { %v661_v49 = vpop.f32.mrb[25].mxu0  ;;  %v667_v57 = vadd.f32 %v2682_v46, %v3402_v6 }
 0x122   : > { %v662_v50 = vadd.f32 %v3402_v6, %v661_v49  ;;  %v2734_v10 = vpop.f32.mrb[24].mxu1 }
 0x123   : > { %v3531_v13 = vadd.f32 %v2734_v10, %v3410_v17  ;;  %v991_v14 = vpop.f32.mrb[25].mxu1 }
 0x124   : > { %1370 = vxpose.xlu1.b32.start [1/8] (short) (narrow) %v662_v50, 16  ;;  %1261 = vxpose.xlu0.b32.cont [5/8] (short) (narrow) %v642_v45, 16  ;;  %v2685_v58 = vpop.f32.mrb[26].mxu0  ;;  %v3536_v22 = vadd.f32 %v3410_v17, %v991_v14 }
 0x125   : > { %v671_v60 = vpop.f32.mrb[27].mxu0  ;;  %v677_v16 = vadd.f32 %v2685_v58, %v3402_v6 }
 0x126   : > { %v672_v3 = vadd.f32 %v3402_v6, %v671_v60  ;;  %v2940_v28 = vpack.c.bf16 %v3531_v13, %v3536_v22  ;;  %v2737_v30 = vpop.f32.mrb[26].mxu1 }
 0x127   : > { %v3543_v32 = vadd.f32 %v2737_v30, %v3410_v17  ;;  %v1001_v33 = vpop.f32.mrb[27].mxu1 }
 0x128   : > { %1371 = vxpose.xlu1.b32.cont [2/8] (short) (narrow) %v667_v57, 16  ;;  %1262 = vxpose.xlu0.b32.cont [6/8] (short) (narrow) %v647_v54, 16  ;;  %v2688_v4 = vpop.f32.mrb[28].mxu0  ;;  %v3546_v34 = vadd.f32 %v3410_v17, %v1001_v33 }
 0x129   : > { %v687_v7 = vadd.f32 %v2688_v4, %v3402_v6  ;;  %v681_v8 = vpop.f32.mrb[29].mxu0  ;;  %2941 = vmatprep.subr.bf16.mxu1 %v2940_v28 }
 0x12a   : > { %v682_v9 = vadd.f32 %v3402_v6, %v681_v8  ;;  %v2740_v37 = vpop.f32.mrb[28].mxu1 }
 0x12b   : > { %v3549_v39 = vadd.f32 %v2740_v37, %v3410_v17  ;;  %v1011_v41 = vpop.f32.mrb[29].mxu1 }
 0x12c   : > { %1372 = vxpose.xlu1.b32.cont [3/8] (short) (narrow) %v672_v3, 16  ;;  %1263 = vxpose.xlu0.b32.cont [7/8] (short) (narrow) %v652_v0, 16  ;;  %v2691_v19 = vpop.f32.mrb[30].mxu0 }
 0x12d   : > { %v697_v23 = vadd.f32 %v2691_v19, %v3402_v6  ;;  %v691_v24 = vpop.f32.mrb[31].mxu0 }
 0x12e   : > { %v692_v27 = vadd.f32 %v3402_v6, %v691_v24  ;;  %v3552_v6 = vadd.f32 %v3410_v17, %v1011_v41  ;;  %v2743_v43 = vpop.f32.mrb[30].mxu1 }
 0x12f   : > { %v3555_v45 = vadd.f32 %v2743_v43, %v3410_v17  ;;  %v1021_v46 = vpop.f32.mrb[31].mxu1 }
 0x130   : > { %1373 = vxpose.xlu1.b32.cont [4/8] (short) (narrow) %v677_v16, 16  ;;  %1264 = vxpose.xlu0.b32.end [8/8] (short) (narrow) %v657_v15, 16  ;;  %v3558_v49 = vadd.f32 %v3410_v17, %v1021_v46 }
 0x134   : > { %1374 = vxpose.xlu1.b32.cont [5/8] (short) (narrow) %v682_v9, 16 }
 0x138   : > { %1375 = vxpose.xlu1.b32.cont [6/8] (short) (narrow) %v687_v7, 16 }
 0x13c   : > { %1376 = vxpose.xlu1.b32.cont [7/8] (short) (narrow) %v692_v27, 16 }
 0x140   : > { %1377 = vxpose.xlu1.b32.end [8/8] (short) (narrow) %v697_v23, 16 }
 0x159   : > { %1579 = vrot.lane.b32.xlu0 %v3416_v21, %s3151_s21 }
 0x15d   : > { %1732 = vrot.lane.b32.xlu0 %v3452_v55, %s3151_s21  ;;  %v2952_v55 = vpack.c.bf16 %v3555_v45, %v3558_v49 }
 0x15e   : > { %1730 = vrot.lane.b32.xlu1 %v3455_v56, %s3151_s21 }
 0x161   : > { %1734 = vrot.lane.b32.xlu0 %v3466_v2, %s3151_s21 }
 0x162   : > { %1581 = vrot.lane.b32.xlu1 %v3413_v20, %s3151_s21  ;;  %v2928_v20 = vpack.c.bf16 %v3504_v42, %v3508_v47 }
 0x165   : > { %1736 = vrot.lane.b32.xlu0 %v3463_v1, %s3151_s21 }
 0x166   : > { %1583 = vrot.lane.b32.xlu1 %v3425_v29, %s3151_s21  ;;  %v2936_v29 = vpack.c.bf16 %v3521_v62, %v3526_v5 }
 0x169   : > { %1738 = vrot.lane.b32.xlu0 %v3476_v12, %s3151_s21 }
 0x16a   : > { %1585 = vrot.lane.b32.xlu1 %v3422_v26, %s3151_s21  ;;  %v2932_v26 = vpack.c.bf16 %v3513_v52, %v3518_v59 }
 0x16d   : > { %1740 = vrot.lane.b32.xlu0 %v3473_v11, %s3151_s21 }
 0x16e   : > { %1587 = vrot.lane.b32.xlu1 %v3435_v38, %s3151_s21  ;;  %v2944_v38 = vpack.c.bf16 %v3543_v32, %v3546_v34 }
 0x171   : > { %1742 = vrot.lane.b32.xlu0 %v3487_v25, %s3151_s21 }
 0x172   : > { %1589 = vrot.lane.b32.xlu1 %v3432_v35, %s3151_s21 }
 0x174   : > { %v1046_v17 = vpop.trf.xlu0 }
 0x175   : > { %2760 = vmatprep.mubr.msk.f32.mxu0 %vm1062_vm1, %v1046_v17  ;;  %1744 = vrot.lane.b32.xlu0 %v3482_v18, %s3151_s21 }
 0x176   : > { %1591 = vrot.lane.b32.xlu1 %v3446_v48, %s3151_s21  ;;  %v2948_v48 = vpack.c.bf16 %v3549_v39, %v3552_v6 }
 0x178   : > { %v1047_v21 = vpop.trf.xlu0 }
 0x179   : > { %2761 = vmatmul.mubr.msk.f32.vlgmr.msra.gmra.mrb[32].mxu0 %vm1062_vm1, %v1047_v21 }
 0x17a   : > { %1593 = vrot.lane.b32.xlu1 %v3442_v44, %s3151_s21  ;;  %2927 = vmatpush3.bf16.msra.mxu0 %v3501_v40 }
 0x17b   : > { %2929 = vmatprep.subr.bf16.mxu0 %v2928_v20 }
 0x17e   : > { %2931 = vmatpush3.bf16.msra.mxu0 %v2928_v20  ;;  %1881 = vrot.lane.b32.xlu1 %v3496_v36, %s3151_s21 }
 0x17f   : > { %2933 = vmatprep.subr.bf16.mxu0 %v2932_v26 }
 0x182   : > { %2935 = vmatpush3.bf16.msra.mxu0 %v2932_v26 }
 0x183   : > { %2937 = vmatprep.subr.bf16.mxu0 %v2936_v29 }
 0x184   : > { %v1160_v35 = vpop.trf.xlu1 }
 0x185   : > { %2779 = vmatprep.mubr.msk.f32.mxu1 %vm1062_vm1, %v1160_v35 }
 0x186   : > { %2939 = vmatpush3.bf16.msra.mxu0 %v2936_v29 }
 0x188   : > { %v1161_v44 = vpop.trf.xlu1 }
 0x189   : > { %2780 = vmatmul.mubr.msk.f32.vlgmr.msra.gmra.mrb[32].mxu1 %vm1062_vm1, %v1161_v44 }
 0x18a   : > { %2943 = vmatpush3.bf16.msra.mxu1 %v2940_v28 }
 0x18b   : > { %2945 = vmatprep.subr.bf16.mxu1 %v2944_v38 }
 0x18e   : > { %2947 = vmatpush3.bf16.msra.mxu1 %v2944_v38 }
 0x18f   : > { %2949 = vmatprep.subr.bf16.mxu1 %v2948_v48 }
 0x192   : > { %2951 = vmatpush3.bf16.msra.mxu1 %v2948_v48 }
 0x193   : > { %2953 = vmatprep.subr.bf16.mxu1 %v2952_v55 }
 0x194   : > { %v1273_v56 = vpop.trf.xlu0 }
 0x195   : > { %2798 = vmatprep.mubr.msk.f32.mxu0 %vm1062_vm1, %v1273_v56 }
 0x196   : > { %2955 = vmatpush3.bf16.msra.mxu1 %v2952_v55 }
 0x198   : > { %v1274_v1 = vpop.trf.xlu0 }
 0x199   : > { %2799 = vmatmul.mubr.msk.f32.vlgmr.msra.gmra.mrb[34].mxu0 %vm1062_vm1, %v1274_v1 }
 0x1a4   : > { %v1386_v2 = vpop.trf.xlu1 }
 0x1a5   : > { %2817 = vmatprep.mubr.msk.f32.mxu1 %vm1062_vm1, %v1386_v2 }
 0x1a8   : > { %v1387_v11 = vpop.trf.xlu1 }
 0x1a9   : > { %2818 = vmatmul.mubr.msk.f32.vlgmr.msra.gmra.mrb[34].mxu1 %vm1062_vm1, %v1387_v11 }
 0x1cb   : > { %v1580_v12 = vpop.permute.xlu0 %1579 }
 0x1cc   : > { %2824 = vmatprep.mubr.msk.f32.mxu0 %vm378_vm0, %v1580_v12 }
 0x1cf   : > { %v3643_v9 = vpop.permute.xlu0 %1732 }
 0x1d0   : > { %v1731_v18 = vpop.permute.xlu1 %1730 }
 0x1d1   : > { %2840 = vmatprep.mubr.msk.f32.mxu1 %vm378_vm0, %v1731_v18 }
 0x1d3   : > { %v3647_v14 = vpop.permute.xlu0 %1734 }
 0x1d4   : > { %v3641_v8 = vpop.permute.xlu1 %1581 }
 0x1d7   : > { %v3651_v16 = vpop.permute.xlu0 %1736 }
 0x1d8   : > { %v3645_v10 = vpop.permute.xlu1 %1583 }
 0x1db   : > { %v3655_v23 = vpop.permute.xlu0 %1738 }
 0x1dc   : > { %v3649_v15 = vpop.permute.xlu1 %1585 }
 0x1df   : > { %v3659_v24 = vpop.permute.xlu0 %1740 }
 0x1e0   : > { %v3653_v19 = vpop.permute.xlu1 %1587 }
 0x1e3   : > { %v3663_v27 = vpop.permute.xlu0 %1742 }
 0x1e7   : > { %v3669_v33 = vpop.permute.xlu0 %1744 }
 0x24c   : > { %v2762_v25 = vpop.f32.mrb[32].mxu0 }
 0x24d   : > { %v1135_v36 = vpop.f32.mrb[33].mxu0  ;;  %v1486_v40 = vsel %vm378_vm0, %v2762_v25, -inf }
 0x24e   : > { %1487 = vmax.xlane.f32.xlu1 %v1486_v40  ;;  %v1483_v50 = vsel %vm378_vm0, %v1135_v36, -inf }
 0x24f   : > { %1484 = vmax.xlane.f32.xlu0 %v1483_v50 }
 0x25c   : > { %v2781_v51 = vpop.f32.mrb[32].mxu1 }
 0x25d   : > { %v1248_v53 = vpop.f32.mrb[33].mxu1  ;;  %v1492_v54 = vsel %vm378_vm0, %v2781_v51, -inf }
 0x25e   : > { %1493 = vmax.xlane.f32.xlu1 %v1492_v54  ;;  %v1489_v57 = vsel %vm378_vm0, %v1248_v53, -inf }
 0x262   : > { %1490 = vmax.xlane.f32.xlu1 %v1489_v57 }
 0x26c   : > { %v3621_v58 = vpop.f32.mrb[34].mxu0 }
 0x26d   : > { %v3623_v60 = vpop.f32.mrb[35].mxu0  ;;  %v1498_v61 = vsel %vm378_vm0, %v3621_v58, -inf }
 0x26e   : > { %1499 = vmax.xlane.f32.xlu1 %v1498_v61  ;;  %v1495_v63 = vsel %vm378_vm0, %v3623_v60, -inf }
 0x26f   : > { %1496 = vmax.xlane.f32.xlu0 %v1495_v63 }
 0x27c   : > { %v3629_v0 = vpop.f32.mrb[34].mxu1 }
 0x27d   : > { %v3631_v3 = vpop.f32.mrb[35].mxu1  ;;  %v1504_v4 = vsel %vm378_vm0, %v3629_v0, -inf }
 0x27e   : > { %1505 = vmax.xlane.f32.xlu1 %v1504_v4  ;;  %v1501_v7 = vsel %vm378_vm0, %v3631_v3, -inf }
 0x27f   : > { %1502 = vmax.xlane.f32.xlu0 %v1501_v7 }
 0x28f   : > { %1883 = vrot.lane.b32.xlu1 %v3492_v31, %s3151_s21  ;;  %v3657_v31 = vpop.permute.xlu1 %1589 }
 0x295   : > { %2032 = vrot.lane.b32.xlu0 %v3536_v22, %s3151_s21  ;;  %v3661_v22 = vpop.permute.xlu1 %1591 }
 0x299   : > { %v3665_v28 = vpop.permute.xlu1 %1593 }
 0x29d   : > { %v3667_v30 = vpop.permute.xlu1 %1881 }
 0x2db   : > { %v1488_v37 = vpop.xlane.xlu1 %1487 }
 0x2dc   : > { %v1508_v41 = vsub.f32 %v2762_v25, %v1488_v37  ;;  %v1485_v43 = vpop.xlane.xlu0 %1484 }
 0x2dd   : > { %v1507_v46 = vsub.f32 %v1135_v36, %v1485_v43 }
 0x2de   : > { %v1517_v17 = vmul.f32 1.442695, %v1508_v41 }
 0x2df   : > { %v1515_v20 = vmul.f32 1.442695, %v1507_v46 }
 0x2e0   : > { %3023 = vpow2.f32 %v1517_v17 }
 0x2e1   : > { %3025 = vpow2.f32 %v1515_v20 }
 0x2ea   : > { %v3671_v21 = vpop.eup %3023 }
 0x2eb   : > { %v3673_v26 = vpop.eup %3025  ;;  %v1494_v29 = vpop.xlane.xlu1 %1493  ;;  %v1534_v35 = vsel %vm378_vm0, %v3671_v21, 0.0 }
 0x2ec   : > { %v1510_v38 = vsub.f32 %v2781_v51, %v1494_v29  ;;  %1535 = vadd.xlane.f32.xlu1 %v1534_v35  ;;  %v1531_v44 = vsel %vm378_vm0, %v3673_v26, 0.0 }
 0x2ed   : > { %1532 = vadd.xlane.f32.xlu0 %v1531_v44 }
 0x2ee   : > { %v1521_v48 = vmul.f32 1.442695, %v1510_v38 }
 0x2ef   : > { %v1491_v55 = vpop.xlane.xlu1 %1490 }
 0x2f0   : > { %3027 = vpow2.f32 %v1521_v48  ;;  %v1509_v56 = vsub.f32 %v1248_v53, %v1491_v55 }
 0x2f2   : > { %v1519_v1 = vmul.f32 1.442695, %v1509_v56 }
 0x2f4   : > { %3029 = vpow2.f32 %v1519_v1 }
 0x2fa   : > { %v3679_v2 = vpop.eup %3027 }
 0x2fb   : > { %v1540_v11 = vsel %vm378_vm0, %v3679_v2, 0.0  ;;  %v1500_v25 = vpop.xlane.xlu1 %1499 }
 0x2fc   : > { %1541 = vadd.xlane.f32.xlu1 %v1540_v11  ;;  %v1512_v36 = vsub.f32 %v3621_v58, %v1500_v25  ;;  %v1497_v40 = vpop.xlane.xlu0 %1496  ;;  %v3812_v25 = vstv %s2175_s22 }
 0x2fd   : > { %v1511_v51 = vsub.f32 %v3623_v60, %v1497_v40 }
 0x2fe   : > { %v3683_v12 = vpop.eup %3029  ;;  %v1525_v53 = vmul.f32 1.442695, %v1512_v36 }
 0x2ff   : > { %v1537_v18 = vsel %vm378_vm0, %v3683_v12, 0.0  ;;  %v1523_v61 = vmul.f32 1.442695, %v1511_v51 }
 0x300   : > { %1538 = vadd.xlane.f32.xlu0 %v1537_v18  ;;  %3031 = vpow2.f32 %v1525_v53  ;;  %v3055_v53 = vld [vmem:[%s3264_s9 + $0x8] sm:$0xff] }
 0x301   : > { %3033 = vpow2.f32 %v1523_v61 }
 0x30b   : > { %v1506_v50 = vpop.xlane.xlu1 %1505 }
 0x30c   : > { %v1514_v54 = vsub.f32 %v3629_v0, %v1506_v50  ;;  %v1503_v57 = vpop.xlane.xlu0 %1502 }
 0x30d   : > { %1885 = vrot.lane.b32.xlu1 %v3508_v47, %s3151_s21  ;;  %v1513_v4 = vsub.f32 %v3631_v3, %v1503_v57  ;;  %v3056_v57 = vld [vmem:[%s3264_s9] sm:$0xff] }
 0x30e   : > { %v1529_v63 = vmul.f32 1.442695, %v1514_v54 }
 0x30f   : > { %v1527_v47 = vmul.f32 1.442695, %v1513_v4 }
 0x310   : > { %3035 = vpow2.f32 %v1529_v63 }
 0x311   : > { %3037 = vpow2.f32 %v1527_v47 }
 0x316   : > { %2034 = vrot.lane.b32.xlu0 %v3531_v13, %s3151_s21  ;;  %v3695_v13 = vpop.eup %3031 }
 0x317   : > { %v3697_v58 = vpop.eup %3033  ;;  %v1546_v60 = vsel %vm378_vm0, %v3695_v13, 0.0 }
 0x318   : > { %v1543_v3 = vsel %vm378_vm0, %v3697_v58, 0.0 }
 0x31a   : > { %v3701_v7 = vpop.eup %3035 }
 0x31b   : > { %v1552_v0 = vsel %vm378_vm0, %v3701_v7, 0.0  ;;  %v3707_v37 = vpop.eup %3037 }
 0x31c   : > { %v1549_v41 = vsel %vm378_vm0, %v3707_v37, 0.0 }
 0x331   : > { %1547 = vadd.xlane.f32.xlu1 %v1546_v60 }
 0x335   : > { %1553 = vadd.xlane.f32.xlu1 %v1552_v0  ;;  %1544 = vadd.xlane.f32.xlu0 %v1543_v3 }
 0x339   : > { %1550 = vadd.xlane.f32.xlu0 %v1549_v41 }
 0x346   : > { %1887 = vrot.lane.b32.xlu1 %v3504_v42, %s3151_s21  ;;  %v3733_v42 = vpop.permute.xlu1 %1883 }
 0x34a   : > { %1889 = vrot.lane.b32.xlu1 %v3518_v59, %s3151_s21 }
 0x34e   : > { %1891 = vrot.lane.b32.xlu1 %v3513_v52, %s3151_s21  ;;  %v2033_v52 = vpop.permute.xlu0 %2032 }
 0x34f   : > { %2036 = vrot.lane.b32.xlu0 %v3546_v34, %s3151_s21 }
 0x352   : > { %1893 = vrot.lane.b32.xlu1 %v3526_v5, %s3151_s21 }
 0x353   : > { %2038 = vrot.lane.b32.xlu0 %v3543_v32, %s3151_s21 }
 0x356   : > { %1895 = vrot.lane.b32.xlu1 %v3521_v62, %s3151_s21 }
 0x357   : > { %2040 = vrot.lane.b32.xlu0 %v3552_v6, %s3151_s21 }
 0x35b   : > { %2042 = vrot.lane.b32.xlu0 %v3549_v39, %s3151_s21 }
 0x35f   : > { %2044 = vrot.lane.b32.xlu0 %v3558_v49, %s3151_s21 }
 0x363   : > { %2046 = vrot.lane.b32.xlu0 %v3555_v45, %s3151_s21 }
 0x379   : > { %v1536_v59 = vpop.xlane.xlu1 %1535 }
 0x37a   : > { %3039 = vrcp.f32 %v1536_v59  ;;  %v1533_v5 = vpop.xlane.xlu0 %1532 }
 0x37b   : > { %3041 = vrcp.f32 %v1533_v5  ;;  %v3060_v5 = vld [vmem:[%s3264_s9 + $0x20] sm:$0xff] }
 0x384   : > { %v3040_v62 = vpop.eup %3039 }
 0x385   : > { %v3042_v32 = vpop.eup %3041  ;;  %v1564_v34 = vmul.f32 %v3040_v62, %v3671_v21 }
 0x386   : > { %v1563_v6 = vmul.f32 %v3042_v32, %v3673_v26 }
 0x388   : > { %v2956_v45 = vpack.c.bf16 %v1564_v34, %v1563_v6 }
 0x389   : > { %v1542_v49 = vpop.xlane.xlu1 %1541 }
 0x38a   : > { %2958 = vmatprep.subr.msk.bf16.mxu0 %vm3739_vm2, %v2956_v45  ;;  %3043 = vrcp.f32 %v1542_v49 }
 0x38b   : > { %2961 = vmatpush3.bf16.xpose.msk.msra.mxu0 %vm3739_vm2, %v2956_v45  ;;  %v3061_v45 = vld [vmem:[%s3264_s9 + $0x38] sm:$0xff] }
 0x38d   : > { %v1539_v43 = vpop.xlane.xlu0 %1538 }
 0x38e   : > { %3045 = vrcp.f32 %v1539_v43  ;;  %v3062_v43 = vld [vmem:[%s3264_s9 + $0x30] sm:$0xff] }
 0x392   : > { %2825 = vmatmul.mubr.msk.f32.vlgmr.msra.gmra.mrb[36].mxu0 %vm378_vm0, %v3641_v8 }
 0x393   : > { %2827 = vmatprep.mubr.msk.f32.mxu0 %vm378_vm0, %v3645_v10  ;;  %v2035_v10 = vpop.permute.xlu0 %2034 }
 0x394   : > { %v3044_v46 = vpop.eup %3043 }
 0x395   : > { %v1566_v21 = vmul.f32 %v3044_v46, %v3679_v2 }
 0x396   : > { %2828 = vmatmul.mubr.msk.f32.gmra.mrb[38].mxu0 %vm378_vm0, %v3649_v15 }
 0x397   : > { %2830 = vmatprep.mubr.msk.f32.mxu0 %vm378_vm0, %v3653_v19 }
 0x398   : > { %v3046_v17 = vpop.eup %3045 }
 0x399   : > { %v1565_v20 = vmul.f32 %v3046_v17, %v3683_v12 }
 0x39a   : > { %2831 = vmatmul.mubr.msk.f32.gmra.mrb[40].mxu0 %vm378_vm0, %v3657_v31 }
 0x39b   : > { %2833 = vmatprep.mubr.msk.f32.mxu0 %vm378_vm0, %v3661_v22  ;;  %v2962_v8 = vpack.c.bf16 %v1566_v21, %v1565_v20 }
 0x39d   : > { %2964 = vmatprep.subr.msk.bf16.mxu1 %vm3739_vm2, %v2962_v8 }
 0x39e   : > { %2834 = vmatmul.mubr.msk.f32.gmra.mrb[42].mxu0 %vm378_vm0, %v3665_v28  ;;  %2967 = vmatpush3.bf16.xpose.msk.msra.mxu1 %vm3739_vm2, %v2962_v8 }
 0x39f   : > { %2856 = vmatprep.mubr.msk.f32.mxu0 %vm378_vm0, %v3667_v30 }
 0x3a5   : > { %2841 = vmatmul.mubr.msk.f32.vlgmr.msra.gmra.mrb[36].mxu1 %vm378_vm0, %v3643_v9  ;;  %v1886_v9 = vpop.permute.xlu1 %1885 }
 0x3a6   : > { %2843 = vmatprep.mubr.msk.f32.mxu1 %vm378_vm0, %v3647_v14 }
 0x3a9   : > { %2844 = vmatmul.mubr.msk.f32.gmra.mrb[38].mxu1 %vm378_vm0, %v3651_v16 }
 0x3aa   : > { %2846 = vmatprep.mubr.msk.f32.mxu1 %vm378_vm0, %v3655_v23 }
 0x3ad   : > { %2847 = vmatmul.mubr.msk.f32.gmra.mrb[40].mxu1 %vm378_vm0, %v3659_v24 }
 0x3ae   : > { %2849 = vmatprep.mubr.msk.f32.mxu1 %vm378_vm0, %v3663_v27 }
 0x3b1   : > { %2850 = vmatmul.mubr.msk.f32.gmra.mrb[42].mxu1 %vm378_vm0, %v3669_v33 }
 0x3b2   : > { %2872 = vmatprep.mubr.msk.f32.mxu1 %vm378_vm0, %v2033_v52  ;;  %v3059_v52 = vld [vmem:[%s3264_s9 + $0x28] sm:$0xff] }
 0x3be   : > { %v1548_v14 = vpop.xlane.xlu1 %1547 }
 0x3bf   : > { %3047 = vrcp.f32 %v1548_v14  ;;  %v3064_v14 = vld [vmem:[%s3264_s9 + $0x40] sm:$0xff] }
 0x3c2   : > { %v1554_v15 = vpop.xlane.xlu1 %1553  ;;  %v1545_v16 = vpop.xlane.xlu0 %1544 }
 0x3c3   : > { %3049 = vrcp.f32 %v1545_v16 }
 0x3c4   : > { %3051 = vrcp.f32 %v1554_v15 }
 0x3c6   : > { %v1551_v19 = vpop.xlane.xlu0 %1550  ;;  %v1888_v22 = vpop.permute.xlu1 %1887 }
 0x3c7   : > { %3053 = vrcp.f32 %v1551_v19 }
 0x3c9   : > { %v3048_v31 = vpop.eup %3047 }
 0x3ca   : > { %v2037_v23 = vpop.permute.xlu0 %2036  ;;  %v1568_v30 = vmul.f32 %v3048_v31, %v3695_v13  ;;  %v1890_v44 = vpop.permute.xlu1 %1889 }
 0x3cd   : > { %v3050_v24 = vpop.eup %3049 }
 0x3ce   : > { %v3052_v27 = vpop.eup %3051  ;;  %v1567_v28 = vmul.f32 %v3050_v24, %v3697_v58  ;;  %v2039_v26 = vpop.permute.xlu0 %2038  ;;  %v3057_v58 = vld [vmem:[%s3264_s9 + $0x18] sm:$0xff] }
 0x3cf   : > { %v1570_v38 = vmul.f32 %v3052_v27, %v3701_v7  ;;  %v1892_v56 = vpop.permute.xlu1 %1891  ;;  %v3058_v7 = vld [vmem:[%s3264_s9 + $0x10] sm:$0xff]  ;;  %v3065_v24 = vld [vmem:[%s3264_s9 + $0x58] sm:$0xff] }
 0x3d0   : > { %v2968_v29 = vpack.c.bf16 %v1568_v30, %v1567_v28  ;;  %v3066_v27 = vld [vmem:[%s3264_s9 + $0x50] sm:$0xff] }
 0x3d1   : > { %v3054_v33 = vpop.eup %3053 }
 0x3d2   : > { %v1569_v35 = vmul.f32 %v3054_v33, %v3707_v37  ;;  %2970 = vmatprep.subr.msk.bf16.mxu0 %vm3739_vm2, %v2968_v29  ;;  %v2041_v55 = vpop.permute.xlu0 %2040 }
 0x3d3   : > { %2973 = vmatpush3.bf16.xpose.msk.msra.mxu0 %vm3739_vm2, %v2968_v29  ;;  %v1894_v2 = vpop.permute.xlu1 %1893 }
 0x3d4   : > { %v2974_v48 = vpack.c.bf16 %v1570_v38, %v1569_v35  ;;  %v3067_v35 = vld [vmem:[%s3264_s9 + $0x68] sm:$0xff] }
 0x3d6   : > { %2976 = vmatprep.subr.msk.bf16.mxu1 %vm3739_vm2, %v2974_v48  ;;  %v2043_v1 = vpop.permute.xlu0 %2042 }
 0x3d7   : > { %2979 = vmatpush3.bf16.xpose.msk.msra.mxu1 %vm3739_vm2, %v2974_v48  ;;  %v1896_v12 = vpop.permute.xlu1 %1895 }
 0x3da   : > { %2857 = vmatmul.mubr.msk.f32.vlgmr.msra.gmra.mrb[44].mxu0 %vm378_vm0, %v3733_v42  ;;  %v2045_v11 = vpop.permute.xlu0 %2044 }
 0x3db   : > { %2859 = vmatprep.mubr.msk.f32.mxu0 %vm378_vm0, %v1886_v9  ;;  %v3063_v9 = vld [vmem:[%s3264_s9 + $0x48] sm:$0xff] }
 0x3de   : > { %2873 = vmatmul.mubr.msk.f32.vlgmr.msra.gmra.mrb[44].mxu1 %vm378_vm0, %v2035_v10  ;;  %2860 = vmatmul.mubr.msk.f32.gmra.mrb[46].mxu0 %vm378_vm0, %v1888_v22  ;;  %v2047_v18 = vpop.permute.xlu0 %2046 }
 0x3df   : > { %2875 = vmatprep.mubr.msk.f32.mxu1 %vm378_vm0, %v2037_v23  ;;  %2862 = vmatprep.mubr.msk.f32.mxu0 %vm378_vm0, %v1890_v44  ;;  %v3068_v44 = vld [vmem:[%s3264_s9 + $0x60] sm:$0xff] }
 0x3e2   : > { %2876 = vmatmul.mubr.msk.f32.gmra.mrb[46].mxu1 %vm378_vm0, %v2039_v26  ;;  %2863 = vmatmul.mubr.msk.f32.gmra.mrb[48].mxu0 %vm378_vm0, %v1892_v56 }
 0x3e3   : > { %2878 = vmatprep.mubr.msk.f32.mxu1 %vm378_vm0, %v2041_v55  ;;  %2865 = vmatprep.mubr.msk.f32.mxu0 %vm378_vm0, %v1894_v2 }
 0x3e6   : > { %2879 = vmatmul.mubr.msk.f32.gmra.mrb[48].mxu1 %vm378_vm0, %v2043_v1  ;;  %2866 = vmatmul.mubr.msk.f32.gmra.mrb[50].mxu0 %vm378_vm0, %v1896_v12 }
 0x3e7   : > { %2881 = vmatprep.mubr.msk.f32.mxu1 %vm378_vm0, %v2045_v11  ;;  %v3069_v11 = vld [vmem:[%s3264_s9 + $0x78] sm:$0xff] }
 0x3ea   : > { %2882 = vmatmul.mubr.msk.f32.gmra.mrb[50].mxu1 %vm378_vm0, %v2047_v18  ;;  %v3070_v18 = vld [vmem:[%s3264_s9 + $0x70] sm:$0xff] }
 0x465   : > { %v2826_v36 = vpop.f32.mrb[36].mxu0 }
 0x466   : > { %v2178_v40 = vmul.f32 %v2826_v36, %v3812_v25  ;;  %v1683_v50 = vpop.f32.mrb[37].mxu0 }
 0x467   : > { %v2177_v51 = vmul.f32 %v3812_v25, %v1683_v50 }
 0x468   : > { %v2210_v54 = vadd.f32 %v3055_v53, %v2178_v40 }
 0x469   : > { %v2209_v61 = vadd.f32 %v3056_v57, %v2177_v51  ;;  %v2829_v63 = vpop.f32.mrb[38].mxu0 }
 0x46a   : > { %2242 = vst.msk [vmem:[%s3820_s25 + $0x8] sm:$0xff] %vm378_vm0, %v2210_v54  ;;  %v2180_v4 = vmul.f32 %v2829_v63, %v3812_v25  ;;  %v1693_v47 = vpop.f32.mrb[39].mxu0  ;;  %v3071_v54 = vld [vmem:[%s3264_s9 + $0x88] sm:$0xff]  ;;  %v3072_v63 = vld [vmem:[%s3264_s9 + $0x80] sm:$0xff] }
 0x46b   : > { %2241 = vst.msk [vmem:[%s3820_s25] sm:$0xff] %vm378_vm0, %v2209_v61  ;;  %v2179_v13 = vmul.f32 %v3812_v25, %v1693_v47 }
 0x46c   : > { %v2212_v60 = vadd.f32 %v3057_v58, %v2180_v4 }
 0x46d   : > { %v2211_v0 = vadd.f32 %v3058_v7, %v2179_v13  ;;  %v2832_v3 = vpop.f32.mrb[40].mxu0 }
 0x46e   : > { %2244 = vst.msk [vmem:[%s3820_s25 + $0x18] sm:$0xff] %vm378_vm0, %v2212_v60  ;;  %v2182_v37 = vmul.f32 %v2832_v3, %v3812_v25  ;;  %v1703_v41 = vpop.f32.mrb[41].mxu0  ;;  %v3073_v3 = vld [vmem:[%s3264_s9 + $0xc8] sm:$0xff] }
 0x46f   : > { %2243 = vst.msk [vmem:[%s3820_s25 + $0x10] sm:$0xff] %vm378_vm0, %v2211_v0  ;;  %v2181_v42 = vmul.f32 %v3812_v25, %v1703_v41 }
 0x470   : > { %v2214_v59 = vadd.f32 %v3059_v52, %v2182_v37 }
 0x471   : > { %v2213_v62 = vadd.f32 %v3060_v5, %v2181_v42  ;;  %v2835_v32 = vpop.f32.mrb[42].mxu0  ;;  %v3074_v42 = vld [vmem:[%s3264_s9 + $0x98] sm:$0xff] }
 0x472   : > { %2246 = vst.msk [vmem:[%s3820_s25 + $0x28] sm:$0xff] %vm378_vm0, %v2214_v59  ;;  %v2184_v34 = vmul.f32 %v2835_v32, %v3812_v25  ;;  %v1713_v6 = vpop.f32.mrb[43].mxu0  ;;  %v3075_v59 = vld [vmem:[%s3264_s9 + $0xc0] sm:$0xff]  ;;  %v3076_v32 = vld [vmem:[%s3264_s9 + $0x90] sm:$0xff] }
 0x473   : > { %2245 = vst.msk [vmem:[%s3820_s25 + $0x20] sm:$0xff] %vm378_vm0, %v2213_v62  ;;  %v2183_v39 = vmul.f32 %v3812_v25, %v1713_v6 }
 0x474   : > { %v2216_v49 = vadd.f32 %v3061_v45, %v2184_v34 }
 0x475   : > { %v2215_v46 = vadd.f32 %v3062_v43, %v2183_v39 }
 0x476   : > { %2248 = vst.msk [vmem:[%s3820_s25 + $0x38] sm:$0xff] %vm378_vm0, %v2216_v49 }
 0x477   : > { %2247 = vst.msk [vmem:[%s3820_s25 + $0x30] sm:$0xff] %vm378_vm0, %v2215_v46 }
 0x478   : > { %v2842_v17 = vpop.f32.mrb[36].mxu1 }
 0x479   : > { %v2186_v20 = vmul.f32 %v2842_v17, %v3812_v25  ;;  %v1834_v21 = vpop.f32.mrb[37].mxu1  ;;  %v3077_v17 = vld [vmem:[%s3264_s9 + $0xd8] sm:$0xff] }
 0x47a   : > { %v2185_v8 = vmul.f32 %v3812_v25, %v1834_v21 }
 0x47b   : > { %v2218_v10 = vadd.f32 %v3063_v9, %v2186_v20 }
 0x47c   : > { %v2217_v15 = vadd.f32 %v3064_v14, %v2185_v8  ;;  %v2845_v16 = vpop.f32.mrb[38].mxu1  ;;  %v3078_v8 = vld [vmem:[%s3264_s9 + $0xa8] sm:$0xff] }
 0x47d   : > { %2250 = vst.msk [vmem:[%s3820_s25 + $0x48] sm:$0xff] %vm378_vm0, %v2218_v10  ;;  %v2188_v19 = vmul.f32 %v2845_v16, %v3812_v25  ;;  %v1844_v23 = vpop.f32.mrb[39].mxu1  ;;  %v3079_v10 = vld [vmem:[%s3264_s9 + $0xd0] sm:$0xff]  ;;  %v3080_v16 = vld [vmem:[%s3264_s9 + $0xa0] sm:$0xff] }
 0x47e   : > { %2249 = vst.msk [vmem:[%s3820_s25 + $0x40] sm:$0xff] %vm378_vm0, %v2217_v15  ;;  %v2187_v31 = vmul.f32 %v3812_v25, %v1844_v23 }
 0x47f   : > { %v2220_v22 = vadd.f32 %v3065_v24, %v2188_v19 }
 0x480   : > { %v2219_v28 = vadd.f32 %v3066_v27, %v2187_v31  ;;  %v2848_v30 = vpop.f32.mrb[40].mxu1 }
 0x481   : > { %2252 = vst.msk [vmem:[%s3820_s25 + $0x58] sm:$0xff] %vm378_vm0, %v2220_v22  ;;  %v2190_v33 = vmul.f32 %v2848_v30, %v3812_v25  ;;  %v1854_v26 = vpop.f32.mrb[41].mxu1  ;;  %v3081_v30 = vld [vmem:[%s3264_s9 + $0xe8] sm:$0xff] }
 0x482   : > { %2251 = vst.msk [vmem:[%s3820_s25 + $0x50] sm:$0xff] %vm378_vm0, %v2219_v28  ;;  %v2189_v29 = vmul.f32 %v3812_v25, %v1854_v26 }
 0x483   : > { %v2222_v38 = vadd.f32 %v3067_v35, %v2190_v33 }
 0x484   : > { %v2221_v48 = vadd.f32 %v3068_v44, %v2189_v29  ;;  %v2851_v55 = vpop.f32.mrb[42].mxu1  ;;  %v3082_v29 = vld [vmem:[%s3264_s9 + $0xb8] sm:$0xff] }
 0x485   : > { %2254 = vst.msk [vmem:[%s3820_s25 + $0x68] sm:$0xff] %vm378_vm0, %v2222_v38  ;;  %v2192_v56 = vmul.f32 %v2851_v55, %v3812_v25  ;;  %v1864_v1 = vpop.f32.mrb[43].mxu1  ;;  %v3083_v38 = vld [vmem:[%s3264_s9 + $0xe0] sm:$0xff]  ;;  %v3084_v55 = vld [vmem:[%s3264_s9 + $0xb0] sm:$0xff] }
 0x486   : > { %2253 = vst.msk [vmem:[%s3820_s25 + $0x60] sm:$0xff] %vm378_vm0, %v2221_v48  ;;  %v2191_v2 = vmul.f32 %v3812_v25, %v1864_v1 }
 0x487   : > { %v2224_v12 = vadd.f32 %v3069_v11, %v2192_v56 }
 0x488   : > { %v2223_v36 = vadd.f32 %v3070_v18, %v2191_v2 }
 0x489   : > { %2256 = vst.msk [vmem:[%s3820_s25 + $0x78] sm:$0xff] %vm378_vm0, %v2224_v12  ;;  %v3085_v12 = vld [vmem:[%s3264_s9 + $0xf8] sm:$0xff] }
 0x48a   : > { %2255 = vst.msk [vmem:[%s3820_s25 + $0x70] sm:$0xff] %vm378_vm0, %v2223_v36  ;;  %v3086_v36 = vld [vmem:[%s3264_s9 + $0xf0] sm:$0xff] }
 0x4ad   : > { %v2858_v40 = vpop.f32.mrb[44].mxu0 }
 0x4ae   : > { %v2194_v50 = vmul.f32 %v2858_v40, %v3812_v25  ;;  %v1985_v51 = vpop.f32.mrb[45].mxu0 }
 0x4af   : > { %v2193_v53 = vmul.f32 %v3812_v25, %v1985_v51 }
 0x4b0   : > { %v2226_v57 = vadd.f32 %v3071_v54, %v2194_v50 }
 0x4b1   : > { %v2874_v61 = vpop.f32.mrb[44].mxu1  ;;  %v2225_v4 = vadd.f32 %v3072_v63, %v2193_v53  ;;  %v2861_v47 = vpop.f32.mrb[46].mxu0 }
 0x4b2   : > { %v2202_v13 = vmul.f32 %v2874_v61, %v3812_v25  ;;  %v2136_v58 = vpop.f32.mrb[45].mxu1  ;;  %2258 = vst.msk [vmem:[%s3820_s25 + $0x88] sm:$0xff] %vm378_vm0, %v2226_v57  ;;  %v2196_v60 = vmul.f32 %v2861_v47, %v3812_v25  ;;  %v1995_v7 = vpop.f32.mrb[47].mxu0 }
 0x4b3   : > { %v2201_v0 = vmul.f32 %v3812_v25, %v2136_v58  ;;  %2257 = vst.msk [vmem:[%s3820_s25 + $0x80] sm:$0xff] %vm378_vm0, %v2225_v4  ;;  %v2195_v41 = vmul.f32 %v3812_v25, %v1995_v7 }
 0x4b4   : > { %v2234_v37 = vadd.f32 %v3073_v3, %v2202_v13  ;;  %v2228_v52 = vadd.f32 %v3074_v42, %v2196_v60 }
 0x4b5   : > { %v2233_v5 = vadd.f32 %v3075_v59, %v2201_v0  ;;  %v2877_v62 = vpop.f32.mrb[46].mxu1  ;;  %v2227_v34 = vadd.f32 %v3076_v32, %v2195_v41  ;;  %v2864_v6 = vpop.f32.mrb[48].mxu0 }
 0x4b6   : > { %2266 = vst.msk [vmem:[%s3820_s25 + $0xc8] sm:$0xff] %vm378_vm0, %v2234_v37  ;;  %v2204_v39 = vmul.f32 %v2877_v62, %v3812_v25  ;;  %v2146_v45 = vpop.f32.mrb[47].mxu1  ;;  %2260 = vst.msk [vmem:[%s3820_s25 + $0x98] sm:$0xff] %vm378_vm0, %v2228_v52  ;;  %v2198_v49 = vmul.f32 %v2864_v6, %v3812_v25  ;;  %v2005_v43 = vpop.f32.mrb[49].mxu0 }
 0x4b7   : > { %2265 = vst.msk [vmem:[%s3820_s25 + $0xc0] sm:$0xff] %vm378_vm0, %v2233_v5  ;;  %v2203_v46 = vmul.f32 %v3812_v25, %v2146_v45  ;;  %2259 = vst.msk [vmem:[%s3820_s25 + $0x90] sm:$0xff] %vm378_vm0, %v2227_v34  ;;  %v2197_v21 = vmul.f32 %v3812_v25, %v2005_v43 }
 0x4b8   : > { %v2236_v20 = vadd.f32 %v3077_v17, %v2204_v39  ;;  %v2230_v9 = vadd.f32 %v3078_v8, %v2198_v49 }
 0x4b9   : > { %v2235_v14 = vadd.f32 %v3079_v10, %v2203_v46  ;;  %v2880_v15 = vpop.f32.mrb[48].mxu1  ;;  %v2229_v19 = vadd.f32 %v3080_v16, %v2197_v21  ;;  %v2867_v23 = vpop.f32.mrb[50].mxu0 }
 0x4ba   : > { %2268 = vst.msk [vmem:[%s3820_s25 + $0xd8] sm:$0xff] %vm378_vm0, %v2236_v20  ;;  %v2206_v31 = vmul.f32 %v2880_v15, %v3812_v25  ;;  %v2156_v24 = vpop.f32.mrb[49].mxu1  ;;  %2262 = vst.msk [vmem:[%s3820_s25 + $0xa8] sm:$0xff] %vm378_vm0, %v2230_v9  ;;  %v2200_v22 = vmul.f32 %v2867_v23, %v3812_v25  ;;  %v2015_v27 = vpop.f32.mrb[51].mxu0 }
 0x4bb   : > { %2267 = vst.msk [vmem:[%s3820_s25 + $0xd0] sm:$0xff] %vm378_vm0, %v2235_v14  ;;  %v2205_v28 = vmul.f32 %v3812_v25, %v2156_v24  ;;  %2261 = vst.msk [vmem:[%s3820_s25 + $0xa0] sm:$0xff] %vm378_vm0, %v2229_v19  ;;  %v2199_v26 = vmul.f32 %v3812_v25, %v2015_v27 }
 0x4bc   : > { %v2238_v33 = vadd.f32 %v3081_v30, %v2206_v31  ;;  %v2232_v35 = vadd.f32 %v3082_v29, %v2200_v22 }
 0x4bd   : > { %v2237_v44 = vadd.f32 %v3083_v38, %v2205_v28  ;;  %v2883_v48 = vpop.f32.mrb[50].mxu1  ;;  %v2231_v56 = vadd.f32 %v3084_v55, %v2199_v26 }
 0x4be   : > { %2270 = vst.msk [vmem:[%s3820_s25 + $0xe8] sm:$0xff] %vm378_vm0, %v2238_v33  ;;  %v2208_v1 = vmul.f32 %v2883_v48, %v3812_v25  ;;  %v2166_v2 = vpop.f32.mrb[51].mxu1  ;;  %2264 = vst.msk [vmem:[%s3820_s25 + $0xb8] sm:$0xff] %vm378_vm0, %v2232_v35 }
 0x4bf   : > { %2269 = vst.msk [vmem:[%s3820_s25 + $0xe0] sm:$0xff] %vm378_vm0, %v2237_v44  ;;  %v2207_v11 = vmul.f32 %v3812_v25, %v2166_v2  ;;  %2263 = vst.msk [vmem:[%s3820_s25 + $0xb0] sm:$0xff] %vm378_vm0, %v2231_v56 }
 0x4c0   : > { %v2240_v18 = vadd.f32 %v3085_v12, %v2208_v1 }
 0x4c1   : > { %v2239_v40 = vadd.f32 %v3086_v36, %v2207_v11 }
 0x4c2   : > { %2272 = vst.msk [vmem:[%s3820_s25 + $0xf8] sm:$0xff] %vm378_vm0, %v2240_v18 }
 0x4c3   : > { %2271 = vst.msk [vmem:[%s3820_s25 + $0xf0] sm:$0xff] %vm378_vm0, %v2239_v40 }
 0x4c4   : > { %3100 = shalt.err (!%p3097_p4)
}
 0x4c5   : > { %s3101_s9 = scalar_lea.hbm %s3946_s15, 4096  ;;  %s3105_s23 = scalar_lea.hbm %s4005_s7, 8192 }
 0x4c6   : > { %p3102_p7 = scmp.ne.s32.totalorder %s3946_s15, %s3101_s9  ;;  %p3106_p10 = scmp.lt.u32.totalorder %s3946_s15, %s4005_s7 }
 0x4c7   : > { %p3107_p11 = scmp.lt.u32.totalorder %s3105_s23, %s3101_s9  ;;  %p3109_p13 = scmp.lt.u32.totalorder %s3101_s9, %s3946_s15 }
 0x4c8   : > { %p3103_p8 = pnand %p3102_p7, %p3236_p5 }
 0x4c9   : > { %p3108_p12 = por %p3107_p11, %p3106_p10 }
 0x4ca   : > { %p3104_p9 = pneg %p3103_p8 }
 0x4cb   : > { %p3110_p0 = por %p3109_p13, %p3108_p12 }
 0x4cd   : > { %p3111_p1 = pnand %p3110_p0, %p3104_p9 }
 0x4cf   : > { %3114 = shalt.err (!%p3111_p1)
}
 0x4d0   : > { %s3153_s30 = smov 128   ;;  %s3154_s6 = smov 8  }
 0x4d1   : > { %2980 = dma.vmem_to_hbm [thread:$0]  (%p3236_p5), %s3948_s10, 4096, %s3946_s15, %s3957_s16, %s3153_s30, %s3153_s30, %s3154_s6  }
 0x4d2 PF: > { %p2986_p2 = scmp.ge.s32.totalorder %s3149_s29, 2  ;;  %s2302_s14 = sand.u32 1, %s3137_s26  }
 0x4d3   : > { %s2303_s17 = scalar_lea.sflag [#allocation4], %s2302_s14 }
 0x4d4   : > { %p2983_p3 = pnand %p2986_p2, %p3240_p6 }
 0x4d6   : > { %3132 = dma.done.wait (!%p2983_p3), %s2303_s17, 4096  }
 0x4d7   : > { %3134 = vsyncadd (!%p2983_p3), %s2303_s17, 4294963200  ;;  %p18_p4 = scmp.ge.s32.totalorder %s3223_s8, 4   ;;  %s4010_s26 = smov %s3141_s27 }
 0x4d8   : > { %s4011_s27 = smov %s3145_s28  ;;  %s4012_s28 = smov %s3234_s11 }
 0x4d9   : > { %s4013_s29 = smov %s3223_s8  ;;  %20 = sbr.rel (!%p18_p4) target bundleno = 5 (0x5), region = 86 }
 0x4e0   :  { %2308 = vsyncpa [#allocation4], 1 }
 0x4e1   :  { %2310 = vsyncpa [#allocation4 + $0x1], 1 }

</bundles_post_ra>
